<compile_context>
chip_gen: v7x
topology: tpu7x:2x2x1
jax: 0.10.0
libtpu: 0.0.40
codegen_flags: <defaults>
</compile_context>

<pallas_src>
import functools
import math

import jax
import jax.numpy as jnp
import numpy as np
from jax import lax
from jax.experimental import pallas as pl
from jax.experimental.pallas import tpu as pltpu

NEG_SLOPE = 0.01   # nn.LeakyReLU default
BN_EPS = 1e-5


def _leaky(x):
    return jnp.where(x > 0, x, NEG_SLOPE * x)


# ----------------------------------- kernel -----------------------------------
def _bottleneck_kernel(x_ref, halo_ref, w1_ref, t1_ref, w2_ref, t2_ref,
                       w3_ref, t3_ref, o_ref, *, kernel_size, tile_l, seq_len):
    """Grid = (batch, L_tiles).  Channels on sublanes, L on lanes.

    x_ref    : (1, Cin, tile_l)   f32  NCL tile
    halo_ref : (1, 1, Cin, 2*pad) f32  the pad columns just left/right of this tile
    w*_ref   : folded conv+BN weights (bf16); t*_ref additive shifts (f32, (C,1))
    o_ref    : (1, Cout, tile_l)  f32  NCL output tile
    """
    pad = kernel_size // 2
    t = pl.program_id(1)
    w = tile_l + 2 * pad

    # Haloed input window built in VMEM (cheap on-chip concat, no HBM pass).
    hb = halo_ref[0, 0].astype(jnp.bfloat16)                          # (Cin, 2*pad)
    xh = jnp.concatenate(
        [hb[:, :pad], x_ref[0].astype(jnp.bfloat16), hb[:, pad:]], axis=1)  # (Cin, w)

    # ---- conv1 (1x1; BN1 scale folded into weights) + shift + LeakyReLU ----
    h1 = jnp.dot(w1_ref[...], xh, preferred_element_type=jnp.float32)       # (P, w)
    h1 = _leaky(h1 + t1_ref[...])

    # conv2 zero-pads its *input activations*: zero halo columns outside [0, L).
    col = lax.broadcasted_iota(jnp.int32, (1, w), 1)
    gpos = t * tile_l + col - pad
    h1 = jnp.where((gpos >= 0) & (gpos < seq_len), h1, 0.0)
    h1 = h1.astype(jnp.bfloat16)

    # ---- conv2: k taps as k accumulating MXU dots on lane-shifted views ----
    h2 = jnp.dot(w2_ref[0], h1[:, 0:tile_l], preferred_element_type=jnp.float32)
    for dl in range(1, kernel_size):
        h2 += jnp.dot(w2_ref[dl], h1[:, dl:dl + tile_l],
                      preferred_element_type=jnp.float32)
    h2 = _leaky(h2 + t2_ref[...]).astype(jnp.bfloat16)                # (P, tile_l)

    # ---- conv3 (1x1) + BN3 shift + identity residual + LeakyReLU (NCL out) ----
    h3 = jnp.dot(w3_ref[...], h2, preferred_element_type=jnp.float32)       # (Cout, tile_l)
    o_ref[0] = _leaky(h3 + t3_ref[...] + x_ref[0]).astype(o_ref.dtype)


# ------------------------------ host-side prep --------------------------------
def _fold_bn(bias, gamma, beta, mean, var, eps=BN_EPS):
    """Inference BN folded with the conv bias into (scale, shift)."""
    s = gamma / jnp.sqrt(var + eps)
    t = beta + (bias - mean) * s
    return s.astype(jnp.float32), t.astype(jnp.float32)


def _prepare_weights(params):
    """Fold BN scale into weights, transpose for the (C, L) dataflow, cast matmul
    operands to bf16; additive shifts stay f32 column vectors."""
    w1, w2, w3 = params["w1"], params["w2"], params["w3"]   # (Cin,P), (k,P,P)[tap,in,out], (P,Cout)
    cin, p = w1.shape
    cout = w3.shape[1]
    s1, t1 = _fold_bn(params["b1"], *params["bn1"])
    s2, t2 = _fold_bn(params["b2"], *params["bn2"])
    s3, t3 = _fold_bn(params["b3"], *params["bn3"])

    bf = jnp.bfloat16
    w1m = (w1 * s1[None, :]).T.astype(bf)                                # (P, Cin)
    w2m = (jnp.transpose(w2, (0, 2, 1)) * s2[None, :, None]).astype(bf)  # (k, P_out, P_in)
    w3m = (w3 * s3[None, :]).T.astype(bf)                                # (Cout, P)
    return (w1m, t1.reshape(p, 1), w2m, t2.reshape(p, 1),
            w3m, t3.reshape(cout, 1), p, cin, cout)


def _choose_tile(L, target):
    """Largest multiple of 128 that divides L and is <= target; else whole L."""
    best = None
    t = 128
    while t <= min(L, target):
        if L % t == 0:
            best = t
        t += 128
    # TODO(synk): very long L not divisible by 128 falls back to a single whole-L
    # block, which may exceed VMEM on v7x; pad-and-mask would be the robust fix.
    return best if best is not None else L


def bottleneck_pallas(x_ncl, params, kernel_size=3, seq_tile=1024):
    """x_ncl: (N, Cin, L) float32, Cin == 4 * planes (identity residual)."""
    assert kernel_size % 2 == 1 and kernel_size >= 3, \
        "kernel_size must be odd and >= 3 (Conv1d 'same' padding semantics)"
    x_ncl = x_ncl.astype(jnp.float32)
    N, Cin, L = x_ncl.shape
    (w1m, t1, w2m, t2, w3m, t3, P, cin_w, Cout) = _prepare_weights(params)
    assert cin_w == Cin and Cout == Cin, "identity residual needs inplanes == planes*4"
    pad = kernel_size // 2

    # Pick an L tile: as big as possible (amortize per-step overhead) while keeping
    # the per-step activation footprint (x tile + out tile) around ~2 MB.
    budget = 2 * 1024 * 1024
    fit = max(128, (budget // ((Cin + Cout) * 4)) // 128 * 128)
    tile_l = _choose_tile(L, min(seq_tile, fit))
    nt = L // tile_l

    # Tiny host-side halo gather: the 2*pad columns adjacent to each tile
    # (zeroed where outside [0, L)).  The main x tensor is consumed directly in
    # NCL layout with non-overlapping blocks -> no transpose / pad / im2col HBM
    # passes on the host.
    tpos = jnp.arange(nt) * tile_l
    pos = jnp.concatenate(
        [tpos[:, None] - pad + jnp.arange(pad)[None, :],
         tpos[:, None] + tile_l + jnp.arange(pad)[None, :]], axis=1)     # (nt, 2*pad)
    valid = (pos >= 0) & (pos < L)
    halo = jnp.take(x_ncl, jnp.clip(pos, 0, L - 1).reshape(-1), axis=2)  # (N, Cin, nt*2*pad)
    halo = halo.reshape(N, Cin, nt, 2 * pad)
    halo = jnp.where(valid[None, None], halo, 0.0)
    halo = jnp.transpose(halo, (0, 2, 1, 3))                             # (N, nt, Cin, 2*pad)

    flops = 2 * N * L * (P * Cin + kernel_size * P * P + P * Cout)
    bytes_accessed = (x_ncl.size * 4 + halo.size * 4 + N * Cout * L * 4
                      + 2 * (w1m.size + w2m.size + w3m.size)
                      + 4 * (t1.size + t2.size + t3.size))

    step_bytes = (Cin + Cout) * tile_l * 4
    vmem_limit = int(min(64 * 2 ** 20, max(16 * 2 ** 20, 8 * step_bytes)))

    cfull = lambda shape: pl.BlockSpec(shape, lambda n, t: (0,) * len(shape))

    return pl.pallas_call(
        functools.partial(_bottleneck_kernel, kernel_size=kernel_size,
                          tile_l=tile_l, seq_len=L),
        out_shape=jax.ShapeDtypeStruct((N, Cout, L), jnp.float32),
        grid_spec=pltpu.PrefetchScalarGridSpec(
            num_scalar_prefetch=0,
            grid=(N, nt),
            in_specs=[
                pl.BlockSpec((1, Cin, tile_l), lambda n, t: (n, 0, t)),         # x (NCL)
                pl.BlockSpec((1, 1, Cin, 2 * pad), lambda n, t: (n, t, 0, 0)),  # halo cols
                cfull((P, Cin)), cfull((P, 1)),                                 # conv1 / bn1
                cfull((kernel_size, P, P)), cfull((P, 1)),                      # conv2 / bn2
                cfull((Cout, P)), cfull((Cout, 1)),                             # conv3 / bn3
            ],
            out_specs=pl.BlockSpec((1, Cout, tile_l), lambda n, t: (n, 0, t)),
        ),
        compiler_params=pltpu.CompilerParams(
            dimension_semantics=("parallel", "parallel"),
            vmem_limit_bytes=vmem_limit),
        cost_estimate=pl.CostEstimate(flops=flops, transcendentals=0,
                                      bytes_accessed=bytes_accessed),
    )(x_ncl, halo, w1m, t1, w2m, t2, w3m, t3)


# ----------------------------- pure-JAX reference -----------------------------
def bottleneck_ref(x_ncl, params, kernel_size=3):
    def bn(y, gamma, beta, mean, var, eps=BN_EPS):
        return ((y - mean[None, :, None]) / jnp.sqrt(var[None, :, None] + eps)
                * gamma[None, :, None] + beta[None, :, None])

    w1, b1 = params["w1"], params["b1"]            # (Cin, P)
    y = jnp.einsum("ncl,cp->npl", x_ncl, w1) + b1[None, :, None]
    y = _leaky(bn(y, *params["bn1"]))

    w2, b2 = params["w2"], params["b2"]            # (K, P, P) [tap, cin, cout]
    pad = kernel_size // 2
    L = x_ncl.shape[-1]
    yp = jnp.pad(y, ((0, 0), (0, 0), (pad, pad)))
    y2 = sum(jnp.einsum("ncl,cp->npl", yp[:, :, dl:dl + L], w2[dl])
             for dl in range(kernel_size)) + b2[None, :, None]
    y2 = _leaky(bn(y2, *params["bn2"]))

    w3, b3 = params["w3"], params["b3"]            # (P, 4P)
    y3 = jnp.einsum("ncl,cp->npl", y2, w3) + b3[None, :, None]
    y3 = bn(y3, *params["bn3"])
    return _leaky(y3 + x_ncl)


# ----------------------------- deterministic init -----------------------------
def init_params(key, inplanes, planes, kernel_size):
    cout = planes * 4
    ks = jax.random.split(key, 16)

    def bn_params(k, c):
        k1, k2, k3, k4 = jax.random.split(k, 4)
        return (1.0 + 0.1 * jax.random.normal(k1, (c,), jnp.float32),
                0.1 * jax.random.normal(k2, (c,), jnp.float32),
                0.1 * jax.random.normal(k3, (c,), jnp.float32),
                jax.random.uniform(k4, (c,), jnp.float32, 0.5, 1.5))

    return {
        "w1": jax.random.normal(ks[0], (inplanes, planes), jnp.float32)
              / math.sqrt(inplanes),
        "b1": 0.1 * jax.random.normal(ks[1], (planes,), jnp.float32),
        "bn1": bn_params(ks[2], planes),
        "w2": jax.random.normal(ks[3], (kernel_size, planes, planes), jnp.float32)
              / math.sqrt(kernel_size * planes),
        "b2": 0.1 * jax.random.normal(ks[4], (planes,), jnp.float32),
        "bn2": bn_params(ks[5], planes),
        "w3": jax.random.normal(ks[6], (planes, cout), jnp.float32)
              / math.sqrt(planes),
        "b3": 0.1 * jax.random.normal(ks[7], (cout,), jnp.float32),
        "bn3": bn_params(ks[8], cout),
    }


if __name__ == "__main__":
    key = jax.random.PRNGKey(0)
    k_x, k_p = jax.random.split(key)

    planes = 32
    inplanes = planes * 4          # identity residual (downsample=None)
    kernel_size = 3
    N, L = 2, 1024                 # with seq_tile=512 -> grid (2, 2): halo path +
                                   # >= 2 parallel steps per axis (v7x megacore)

    x = jax.random.normal(k_x, (N, inplanes, L), jnp.float32)   # NCL, like PyTorch
    params = init_params(k_p, inplanes, planes, kernel_size)

    fwd = jax.jit(functools.partial(bottleneck_pallas, kernel_size=kernel_size,
                                    seq_tile=512))
    out = jax.block_until_ready(fwd(x, params))

    ref = bottleneck_ref(x, params, kernel_size)
    # bf16 MXU operands vs. an f32 reference -> relaxed tolerance.
    np.testing.assert_allclose(np.asarray(out), np.asarray(ref), rtol=2e-2, atol=5e-2)

    print("KERNEL_OK")
</pallas_src>

<mosaic_0001>
module attributes {stable_mosaic.version = 11 : i64} {
  func.func @_bottleneck_kernel(%arg0: i32, %arg1: i32, %arg2: memref<1x128x512xf32, #tpu.memory_space<vmem>>, %arg3: memref<1x1x128x2xf32, #tpu.memory_space<vmem>>, %arg4: memref<32x128xbf16, #tpu.memory_space<vmem>>, %arg5: memref<32x1xf32, #tpu.memory_space<vmem>>, %arg6: memref<3x32x32xbf16, #tpu.memory_space<vmem>>, %arg7: memref<32x1xf32, #tpu.memory_space<vmem>>, %arg8: memref<128x32xbf16, #tpu.memory_space<vmem>>, %arg9: memref<128x1xf32, #tpu.memory_space<vmem>>, %arg10: memref<1x128x512xf32, #tpu.memory_space<vmem>>) attributes {dimension_semantics = [#tpu.dimension_semantics<parallel>, #tpu.dimension_semantics<parallel>], iteration_bounds = array<i64: 2, 2>, scalar_prefetch = 0 : i64, scratch_operands = 0 : i64, tpu.core_type = #tpu.core_type<tc>, window_params = [{transform_indices = @transform_0, window_bounds = array<i64: 1, 128, 512>}, {transform_indices = @transform_1, window_bounds = array<i64: 1, 1, 128, 2>}, {pipeline_mode = #tpu.pipeline_mode<synchronous>, transform_indices = @transform_2, window_bounds = array<i64: 32, 128>}, {pipeline_mode = #tpu.pipeline_mode<synchronous>, transform_indices = @transform_3, window_bounds = array<i64: 32, 1>}, {pipeline_mode = #tpu.pipeline_mode<synchronous>, transform_indices = @transform_4, window_bounds = array<i64: 3, 32, 32>}, {pipeline_mode = #tpu.pipeline_mode<synchronous>, transform_indices = @transform_5, window_bounds = array<i64: 32, 1>}, {pipeline_mode = #tpu.pipeline_mode<synchronous>, transform_indices = @transform_6, window_bounds = array<i64: 128, 32>}, {pipeline_mode = #tpu.pipeline_mode<synchronous>, transform_indices = @transform_7, window_bounds = array<i64: 128, 1>}, {transform_indices = @transform_8, window_bounds = array<i64: 1, 128, 512>}]} {
    %c0 = arith.constant 0 : index
    %c0_0 = arith.constant 0 : index
    %c0_1 = arith.constant 0 : index
    %c0_2 = arith.constant 0 : index
    %0 = vector.load %arg3[%c0, %c0_0, %c0_1, %c0_2] : memref<1x1x128x2xf32, #tpu.memory_space<vmem>>, vector<1x1x128x2xf32>
    %1 = vector.shape_cast %0 : vector<1x1x128x2xf32> to vector<128x2xf32>
    %2 = arith.truncf %1 : vector<128x2xf32> to vector<128x2xbf16>
    %3 = vector.extract_strided_slice %2 {offsets = [0, 0], sizes = [128, 1], strides = [1, 1]} : vector<128x2xbf16> to vector<128x1xbf16>
    %c0_3 = arith.constant 0 : index
    %c0_4 = arith.constant 0 : index
    %c0_5 = arith.constant 0 : index
    %4 = vector.load %arg2[%c0_3, %c0_4, %c0_5] : memref<1x128x512xf32, #tpu.memory_space<vmem>>, vector<1x128x512xf32>
    %5 = vector.shape_cast %4 : vector<1x128x512xf32> to vector<128x512xf32>
    %6 = arith.truncf %5 : vector<128x512xf32> to vector<128x512xbf16>
    %7 = vector.extract_strided_slice %2 {offsets = [0, 1], sizes = [128, 1], strides = [1, 1]} : vector<128x2xbf16> to vector<128x1xbf16>
    %8 = tpu.concatenate %3, %6, %7 in 1 : vector<128x1xbf16>, vector<128x512xbf16>, vector<128x1xbf16> -> vector<128x514xbf16>
    %c0_6 = arith.constant 0 : index
    %c0_7 = arith.constant 0 : index
    %9 = vector.load %arg4[%c0_6, %c0_7] : memref<32x128xbf16, #tpu.memory_space<vmem>>, vector<32x128xbf16>
    %cst = arith.constant dense<0.000000e+00> : vector<32x514xf32>
    %10 = tpu.matmul %9, %8, %cst {dimension_numbers = #tpu.dot_dimension_numbers<[1], [0], [0], [1], [0, 0, 1, 1], [], []>} : vector<32x128xbf16>, vector<128x514xbf16>, vector<32x514xf32> -> vector<32x514xf32>
    %c0_8 = arith.constant 0 : index
    %c0_9 = arith.constant 0 : index
    %11 = vector.load %arg5[%c0_8, %c0_9] : memref<32x1xf32, #tpu.memory_space<vmem>>, vector<32x1xf32>
    %12 = vector.broadcast %11 : vector<32x1xf32> to vector<32x514xf32>
    %13 = arith.addf %10, %12 : vector<32x514xf32>
    %cst_10 = arith.constant 0.000000e+00 : f32
    %14 = vector.broadcast %cst_10 : f32 to vector<32x514xf32>
    %15 = arith.cmpf ogt, %13, %14 : vector<32x514xf32>
    %cst_11 = arith.constant 0.00999999977 : f32
    %16 = vector.broadcast %cst_11 : f32 to vector<32x514xf32>
    %17 = arith.mulf %16, %13 : vector<32x514xf32>
    %18 = arith.select %15, %13, %17 : vector<32x514xi1>, vector<32x514xf32>
    %19 = tpu.iota {dimensions = array<i32: 1>} : vector<1x514xi32>
    %c512_i32 = arith.constant 512 : i32
    %20 = arith.muli %arg1, %c512_i32 : i32
    %21 = vector.broadcast %20 : i32 to vector<1x514xi32>
    %22 = arith.addi %21, %19 : vector<1x514xi32>
    %c1_i32 = arith.constant 1 : i32
    %23 = vector.broadcast %c1_i32 : i32 to vector<1x514xi32>
    %24 = arith.subi %22, %23 : vector<1x514xi32>
    %c0_i32 = arith.constant 0 : i32
    %25 = vector.broadcast %c0_i32 : i32 to vector<1x514xi32>
    %26 = arith.cmpi sge, %24, %25 : vector<1x514xi32>
    %c1024_i32 = arith.constant 1024 : i32
    %27 = vector.broadcast %c1024_i32 : i32 to vector<1x514xi32>
    %28 = arith.cmpi slt, %24, %27 : vector<1x514xi32>
    %29 = arith.andi %26, %28 : vector<1x514xi1>
    %cst_12 = arith.constant 0.000000e+00 : f32
    %30 = vector.shape_cast %29 : vector<1x514xi1> to vector<1x514xi1>
    %31 = vector.broadcast %30 : vector<1x514xi1> to vector<32x514xi1>
    %32 = vector.broadcast %cst_12 : f32 to vector<32x514xf32>
    %33 = arith.select %31, %18, %32 : vector<32x514xi1>, vector<32x514xf32>
    %34 = arith.truncf %33 : vector<32x514xf32> to vector<32x514xbf16>
    %c0_13 = arith.constant 0 : index
    %c0_14 = arith.constant 0 : index
    %c0_15 = arith.constant 0 : index
    %35 = vector.load %arg6[%c0_13, %c0_14, %c0_15] : memref<3x32x32xbf16, #tpu.memory_space<vmem>>, vector<1x32x32xbf16>
    %36 = vector.shape_cast %35 : vector<1x32x32xbf16> to vector<32x32xbf16>
    %37 = vector.extract_strided_slice %34 {offsets = [0, 0], sizes = [32, 512], strides = [1, 1]} : vector<32x514xbf16> to vector<32x512xbf16>
    %cst_16 = arith.constant dense<0.000000e+00> : vector<32x512xf32>
    %38 = tpu.matmul %36, %37, %cst_16 {dimension_numbers = #tpu.dot_dimension_numbers<[1], [0], [0], [1], [0, 0, 1, 1], [], []>} : vector<32x32xbf16>, vector<32x512xbf16>, vector<32x512xf32> -> vector<32x512xf32>
    %c1 = arith.constant 1 : index
    %c0_17 = arith.constant 0 : index
    %c0_18 = arith.constant 0 : index
    %39 = vector.load %arg6[%c1, %c0_17, %c0_18] : memref<3x32x32xbf16, #tpu.memory_space<vmem>>, vector<1x32x32xbf16>
    %40 = vector.shape_cast %39 : vector<1x32x32xbf16> to vector<32x32xbf16>
    %41 = vector.extract_strided_slice %34 {offsets = [0, 1], sizes = [32, 512], strides = [1, 1]} : vector<32x514xbf16> to vector<32x512xbf16>
    %cst_19 = arith.constant dense<0.000000e+00> : vector<32x512xf32>
    %42 = tpu.matmul %40, %41, %cst_19 {dimension_numbers = #tpu.dot_dimension_numbers<[1], [0], [0], [1], [0, 0, 1, 1], [], []>} : vector<32x32xbf16>, vector<32x512xbf16>, vector<32x512xf32> -> vector<32x512xf32>
    %43 = arith.addf %38, %42 : vector<32x512xf32>
    %c2 = arith.constant 2 : index
    %c0_20 = arith.constant 0 : index
    %c0_21 = arith.constant 0 : index
    %44 = vector.load %arg6[%c2, %c0_20, %c0_21] : memref<3x32x32xbf16, #tpu.memory_space<vmem>>, vector<1x32x32xbf16>
    %45 = vector.shape_cast %44 : vector<1x32x32xbf16> to vector<32x32xbf16>
    %46 = vector.extract_strided_slice %34 {offsets = [0, 2], sizes = [32, 512], strides = [1, 1]} : vector<32x514xbf16> to vector<32x512xbf16>
    %cst_22 = arith.constant dense<0.000000e+00> : vector<32x512xf32>
    %47 = tpu.matmul %45, %46, %cst_22 {dimension_numbers = #tpu.dot_dimension_numbers<[1], [0], [0], [1], [0, 0, 1, 1], [], []>} : vector<32x32xbf16>, vector<32x512xbf16>, vector<32x512xf32> -> vector<32x512xf32>
    %48 = arith.addf %43, %47 : vector<32x512xf32>
    %c0_23 = arith.constant 0 : index
    %c0_24 = arith.constant 0 : index
    %49 = vector.load %arg7[%c0_23, %c0_24] : memref<32x1xf32, #tpu.memory_space<vmem>>, vector<32x1xf32>
    %50 = vector.broadcast %49 : vector<32x1xf32> to vector<32x512xf32>
    %51 = arith.addf %48, %50 : vector<32x512xf32>
    %cst_25 = arith.constant 0.000000e+00 : f32
    %52 = vector.broadcast %cst_25 : f32 to vector<32x512xf32>
    %53 = arith.cmpf ogt, %51, %52 : vector<32x512xf32>
    %cst_26 = arith.constant 0.00999999977 : f32
    %54 = vector.broadcast %cst_26 : f32 to vector<32x512xf32>
    %55 = arith.mulf %54, %51 : vector<32x512xf32>
    %56 = arith.select %53, %51, %55 : vector<32x512xi1>, vector<32x512xf32>
    %57 = arith.truncf %56 : vector<32x512xf32> to vector<32x512xbf16>
    %c0_27 = arith.constant 0 : index
    %c0_28 = arith.constant 0 : index
    %58 = vector.load %arg8[%c0_27, %c0_28] : memref<128x32xbf16, #tpu.memory_space<vmem>>, vector<128x32xbf16>
    %cst_29 = arith.constant dense<0.000000e+00> : vector<128x512xf32>
    %59 = tpu.matmul %58, %57, %cst_29 {dimension_numbers = #tpu.dot_dimension_numbers<[1], [0], [0], [1], [0, 0, 1, 1], [], []>} : vector<128x32xbf16>, vector<32x512xbf16>, vector<128x512xf32> -> vector<128x512xf32>
    %c0_30 = arith.constant 0 : index
    %c0_31 = arith.constant 0 : index
    %60 = vector.load %arg9[%c0_30, %c0_31] : memref<128x1xf32, #tpu.memory_space<vmem>>, vector<128x1xf32>
    %61 = vector.broadcast %60 : vector<128x1xf32> to vector<128x512xf32>
    %62 = arith.addf %59, %61 : vector<128x512xf32>
    %c0_32 = arith.constant 0 : index
    %c0_33 = arith.constant 0 : index
    %c0_34 = arith.constant 0 : index
    %63 = vector.load %arg2[%c0_32, %c0_33, %c0_34] : memref<1x128x512xf32, #tpu.memory_space<vmem>>, vector<1x128x512xf32>
    %64 = vector.shape_cast %63 : vector<1x128x512xf32> to vector<128x512xf32>
    %65 = arith.addf %62, %64 : vector<128x512xf32>
    %cst_35 = arith.constant 0.000000e+00 : f32
    %66 = vector.broadcast %cst_35 : f32 to vector<128x512xf32>
    %67 = arith.cmpf ogt, %65, %66 : vector<128x512xf32>
    %cst_36 = arith.constant 0.00999999977 : f32
    %68 = vector.broadcast %cst_36 : f32 to vector<128x512xf32>
    %69 = arith.mulf %68, %65 : vector<128x512xf32>
    %70 = arith.select %67, %65, %69 : vector<128x512xi1>, vector<128x512xf32>
    %c0_37 = arith.constant 0 : index
    %c0_38 = arith.constant 0 : index
    %c0_39 = arith.constant 0 : index
    %71 = vector.load %arg10[%c0_37, %c0_38, %c0_39] : memref<1x128x512xf32, #tpu.memory_space<vmem>>, vector<1x128x512xf32>
    %72 = vector.shape_cast %71 : vector<1x128x512xf32> to vector<128x512xf32>
    %73 = vector.shape_cast %70 : vector<128x512xf32> to vector<1x128x512xf32>
    tpu.vector_store %arg10[%c0_37, %c0_38, %c0_39], %73 {strides = array<i32>} : memref<1x128x512xf32, #tpu.memory_space<vmem>>, vector<1x128x512xf32>,
    return
  }
  func.func @transform_0(%arg0: i32, %arg1: i32) -> (i32, i32, i32) {
    %c0_i32 = arith.constant 0 : i32
    %c0_i32_0 = arith.constant 0 : i32
    return %arg0, %c0_i32, %arg1 : i32, i32, i32
  }
  func.func @transform_1(%arg0: i32, %arg1: i32) -> (i32, i32, i32, i32) {
    %c0_i32 = arith.constant 0 : i32
    %c0_i32_0 = arith.constant 0 : i32
    %c0_i32_1 = arith.constant 0 : i32
    return %arg0, %arg1, %c0_i32, %c0_i32_0 : i32, i32, i32, i32
  }
  func.func @transform_2(%arg0: i32, %arg1: i32) -> (i32, i32) {
    %c0_i32 = arith.constant 0 : i32
    %c0_i32_0 = arith.constant 0 : i32
    %c0_i32_1 = arith.constant 0 : i32
    return %c0_i32, %c0_i32_0 : i32, i32
  }
  func.func @transform_3(%arg0: i32, %arg1: i32) -> (i32, i32) {
    %c0_i32 = arith.constant 0 : i32
    %c0_i32_0 = arith.constant 0 : i32
    %c0_i32_1 = arith.constant 0 : i32
    return %c0_i32, %c0_i32_0 : i32, i32
  }
  func.func @transform_4(%arg0: i32, %arg1: i32) -> (i32, i32, i32) {
    %c0_i32 = arith.constant 0 : i32
    %c0_i32_0 = arith.constant 0 : i32
    %c0_i32_1 = arith.constant 0 : i32
    %c0_i32_2 = arith.constant 0 : i32
    return %c0_i32, %c0_i32_0, %c0_i32_1 : i32, i32, i32
  }
  func.func @transform_5(%arg0: i32, %arg1: i32) -> (i32, i32) {
    %c0_i32 = arith.constant 0 : i32
    %c0_i32_0 = arith.constant 0 : i32
    %c0_i32_1 = arith.constant 0 : i32
    return %c0_i32, %c0_i32_0 : i32, i32
  }
  func.func @transform_6(%arg0: i32, %arg1: i32) -> (i32, i32) {
    %c0_i32 = arith.constant 0 : i32
    %c0_i32_0 = arith.constant 0 : i32
    %c0_i32_1 = arith.constant 0 : i32
    return %c0_i32, %c0_i32_0 : i32, i32
  }
  func.func @transform_7(%arg0: i32, %arg1: i32) -> (i32, i32) {
    %c0_i32 = arith.constant 0 : i32
    %c0_i32_0 = arith.constant 0 : i32
    %c0_i32_1 = arith.constant 0 : i32
    return %c0_i32, %c0_i32_0 : i32, i32
  }
  func.func @transform_8(%arg0: i32, %arg1: i32) -> (i32, i32, i32) {
    %c0_i32 = arith.constant 0 : i32
    %c0_i32_0 = arith.constant 0 : i32
    return %arg0, %c0_i32, %arg1 : i32, i32, i32
  }
}

</mosaic_0001>

<bundles_post_ra>
// kernel: bottleneck_pallas.1
= control target key start
LH: loop header
LB: loop body
LE: loop exit
PB: predicated region body
PF: predicated region fallthrough
CT: control target
= control target key end

     0   :  { %s4230_s0 = inlined_call_operand.vmem [shape: f32[2,128,1024], index: 0, kind: input, shape index: {}]   ;;  %s4231_s1 = inlined_call_operand.vmem [shape: f32[2,2,128,2], index: 1, kind: input, shape index: {}]   ;;  %s4232_s2 = inlined_call_operand.vmem [shape: bf16[32,128], index: 2, kind: input, shape index: {}]   ;;  %s4233_s3 = inlined_call_operand.vmem [shape: f32[32,1], index: 3, kind: input, shape index: {}]   ;;  %s4234_s4 = inlined_call_operand.vmem [shape: bf16[3,32,32], index: 4, kind: input, shape index: {}]   ;;  %s4235_s5 = inlined_call_operand.vmem [shape: f32[32,1], index: 5, kind: input, shape index: {}]   ;;  %s4236_s6 = inlined_call_operand.vmem [shape: bf16[128,32], index: 6, kind: input, shape index: {}]   ;;  %s4237_s7 = inlined_call_operand.vmem [shape: f32[128,1], index: 7, kind: input, shape index: {}]   ;;  %s4238_s8 = inlined_call_operand.hbm [shape: f32[2,128,1024], index: 8, kind: output, shape index: {}]  }
   0x1   :  { %4244 = sst [smem:[#allocation11_spill]] %s4230_s0 }
   0x2   :  { %13 = vsyncpa [#allocation4], 0 }
   0x3   :  { %15 = vsyncpa [#allocation4 + $0x1], 0  ;;  %s3049_s27 = smov 0   ;;  %s3051_s28 = smov 0  }
   0x4   :  { %s3053_s29 = smov 0   ;;  %s3055_s30 = smov 0  }
   0x5   :  { %s3057_s9 = smov 0   ;;  %s3059_s10 = smov 0  }
   0x6   :  { %s3061_s11 = smov 0   ;;  %s3063_s12 = smov 0  }
   0x7 LB: > { %4245 = sst [smem:[#allocation6_spill]] %s2986_s10  ;;  %s2576_s13 = sadd.s32 4294967295, %s2994_s12   ;;  %s2994_s12 = sphi %s3063_s12, %s21_s12   ;;  %s2990_s11 = sphi %s3061_s11, %s4269_s11   ;;  %s2986_s10 = sphi %s3059_s10, %s4268_s10   ;;  %s2982_s9 = sphi %s3057_s9, %s4267_s9   ;;  %s2978_s30 = sphi %s3055_s30, %s4266_s30   ;;  %s2974_s29 = sphi %s3053_s29, %s4272_s29   ;;  %s2970_s28 = sphi %s3051_s28, %s4271_s28   ;;  %s2966_s27 = sphi %s3049_s27, %s4270_s27  }
   0x8   : > { %4246 = sst [smem:[#allocation7_spill]] %s2990_s11  ;;  %s2577_s14 = sadd.s32 4294967294, %s2994_s12  }
   0x9   : > { %s30_s15 = sadd.s32 1, %s2986_s10  ;;  %s33_s16 = sadd.s32 1, %s2990_s11 }
   0xa   : > { %p31_p0 = scmp.ge.s32.totalorder %s30_s15, 2  ;;  %p49_p1 = scmp.ne.s32.totalorder %s2974_s29, %s2970_s28 }
   0xb   : > { %p50_p2 = scmp.eq.s32.totalorder %s2994_s12, 0  ;;  %p235_p5 = scmp.eq.s32.totalorder %s2576_s13, 3 }
   0xc   : > { %s4274_s15 = smov (%p31_p0, %s30_s15), 0  ;;  %s4276_s16 = smov (!%p31_p0, %s33_s16), %s2990_s11 }
   0xd   : > { %4247 = sst [smem:[#allocation8_spill]] %s4274_s15  ;;  %s38_s17 = ssub.s32 %s2986_s10, %s4274_s15 }
   0xe   : > { %p3101_p3 = por %p50_p2, %p49_p1  ;;  %p35_p4 = scmp.ge.s32.totalorder %s4276_s16, 2 }
   0xf   : > { %p240_p6 = scmp.ne.s32.totalorder %s2970_s28, %s2966_s27  ;;  %p241_p7 = scmp.eq.s32.totalorder %s2577_s14, 3 }
  0x10   : > { %s4278_s16 = smov (%p35_p4, %s4276_s16), 0  ;;  %p3109_p8 = por %p235_p5, %p49_p1 }
  0x11   : > { %4249 = sst [smem:[#allocation9_spill]] %s4278_s16  ;;  %p3113_p9 = por %p241_p7, %p240_p6 }
  0x12   : > { %s37_s21 = ssub.s32 %s2990_s11, %s4278_s16  ;;  %s42_s23 = sadd.s32 1, %s2974_s29 }
  0x13   : > { %s39_s22 = sor.u32 %s38_s17, %s37_s21  ;;  %p2579_p11 = scmp.ge.s32.totalorder %s2994_s12, 4 }
  0x14   : > { %p40_p10 = scmp.eq.s32.totalorder %s39_s22, 0 }
  0x15   : > { %275 = sbr.rel (%p2579_p11) target bundleno = 70 (0x46), region = 40 }
  0x16   : > { %s3121_s24 = scalar_select %p40_p10, %s2974_s29, %s42_s23  }
  0x18   : > { %4252 = sst [smem:[#allocation10_spill]] %s3121_s24 }
  0x1c   : > { %278 = sbr.rel (!%p3101_p3) target bundleno = 70 (0x46), region = 44  ;;  %s280_s25 = sand.u32 (%p3101_p3), 1, %s2974_s29  }
  0x1d   : > { %s2581_s26 = sshll.u32 (%p3101_p3), %s2986_s10, 2  ;;  %s2580_s13 = sshll.u32 (%p3101_p3), %s280_s25, 9 }
  0x1e   : > { %s2582_s14 = sshll.u32 (%p3101_p3), %s2990_s11, 7  ;;  %s4253_s0 = sld [smem:[#allocation11_spill]] (%p3101_p3) }
  0x1f   : > { %s285_s15 = sadd.s32 (%p3101_p3), %s2582_s14, %s2581_s26  ;;  %s3137_s18 = scalar_lea.vmem (%p3101_p3), [#allocation2], %s2580_s13 }
  0x20   : > { %s2583_s16 = sshll.u32 (%p3101_p3), %s285_s15, 3 }
  0x24   : > { %s3132_s22 = scalar_lea.vmem %s4253_s0, %s2583_s16 }
  0x25   : > { %v300_v0 = vld [vmem:[%s3132_s22] sm:$0xff]  ;;  %v302_v1 = vld [vmem:[%s3132_s22 + $0x8] sm:$0xff]  ;;  %v304_v2 = vld [vmem:[%s3132_s22 + $0x10] sm:$0xff] }
  0x26   : > { %301 = vst [vmem:[%s3137_s18] sm:$0xff] %v300_v0  ;;  %303 = vst [vmem:[%s3137_s18 + $0x8] sm:$0xff] %v302_v1  ;;  %v306_v3 = vld [vmem:[%s3132_s22 + $0x18] sm:$0xff]  ;;  %v308_v4 = vld [vmem:[%s3132_s22 + $0x40] sm:$0xff] }
  0x27   : > { %305 = vst [vmem:[%s3137_s18 + $0x10] sm:$0xff] %v304_v2  ;;  %v310_v5 = vld [vmem:[%s3132_s22 + $0x48] sm:$0xff]  ;;  %307 = vst [vmem:[%s3137_s18 + $0x18] sm:$0xff] %v306_v3  ;;  %v312_v6 = vld [vmem:[%s3132_s22 + $0x50] sm:$0xff] }
  0x28   : > { %309 = vst [vmem:[%s3137_s18 + $0x20] sm:$0xff] %v308_v4  ;;  %311 = vst [vmem:[%s3137_s18 + $0x28] sm:$0xff] %v310_v5  ;;  %v314_v7 = vld [vmem:[%s3132_s22 + $0x58] sm:$0xff]  ;;  %v316_v8 = vld [vmem:[%s3132_s22 + $0x80] sm:$0xff] }
  0x29   : > { %313 = vst [vmem:[%s3137_s18 + $0x30] sm:$0xff] %v312_v6  ;;  %315 = vst [vmem:[%s3137_s18 + $0x38] sm:$0xff] %v314_v7  ;;  %v318_v9 = vld [vmem:[%s3132_s22 + $0x88] sm:$0xff]  ;;  %v320_v10 = vld [vmem:[%s3132_s22 + $0x90] sm:$0xff] }
  0x2a   : > { %317 = vst [vmem:[%s3137_s18 + $0x40] sm:$0xff] %v316_v8  ;;  %v322_v11 = vld [vmem:[%s3132_s22 + $0x98] sm:$0xff]  ;;  %319 = vst [vmem:[%s3137_s18 + $0x48] sm:$0xff] %v318_v9  ;;  %v324_v12 = vld [vmem:[%s3132_s22 + $0xc0] sm:$0xff] }
  0x2b   : > { %321 = vst [vmem:[%s3137_s18 + $0x50] sm:$0xff] %v320_v10  ;;  %323 = vst [vmem:[%s3137_s18 + $0x58] sm:$0xff] %v322_v11  ;;  %v326_v13 = vld [vmem:[%s3132_s22 + $0xc8] sm:$0xff]  ;;  %v328_v14 = vld [vmem:[%s3132_s22 + $0xd0] sm:$0xff] }
  0x2c   : > { %325 = vst [vmem:[%s3137_s18 + $0x60] sm:$0xff] %v324_v12  ;;  %327 = vst [vmem:[%s3137_s18 + $0x68] sm:$0xff] %v326_v13  ;;  %v330_v15 = vld [vmem:[%s3132_s22 + $0xd8] sm:$0xff]  ;;  %v332_v16 = vld [vmem:[%s3132_s22 + $0x100] sm:$0xff] }
  0x2d   : > { %329 = vst [vmem:[%s3137_s18 + $0x70] sm:$0xff] %v328_v14  ;;  %v334_v17 = vld [vmem:[%s3132_s22 + $0x108] sm:$0xff]  ;;  %331 = vst [vmem:[%s3137_s18 + $0x78] sm:$0xff] %v330_v15  ;;  %v336_v18 = vld [vmem:[%s3132_s22 + $0x110] sm:$0xff] }
  0x2e   : > { %333 = vst [vmem:[%s3137_s18 + $0x80] sm:$0xff] %v332_v16  ;;  %335 = vst [vmem:[%s3137_s18 + $0x88] sm:$0xff] %v334_v17  ;;  %v338_v19 = vld [vmem:[%s3132_s22 + $0x118] sm:$0xff]  ;;  %v340_v20 = vld [vmem:[%s3132_s22 + $0x140] sm:$0xff] }
  0x2f   : > { %337 = vst [vmem:[%s3137_s18 + $0x90] sm:$0xff] %v336_v18  ;;  %339 = vst [vmem:[%s3137_s18 + $0x98] sm:$0xff] %v338_v19  ;;  %v342_v21 = vld [vmem:[%s3132_s22 + $0x148] sm:$0xff]  ;;  %v344_v22 = vld [vmem:[%s3132_s22 + $0x150] sm:$0xff] }
  0x30   : > { %341 = vst [vmem:[%s3137_s18 + $0xa0] sm:$0xff] %v340_v20  ;;  %v346_v23 = vld [vmem:[%s3132_s22 + $0x158] sm:$0xff]  ;;  %343 = vst [vmem:[%s3137_s18 + $0xa8] sm:$0xff] %v342_v21  ;;  %v348_v24 = vld [vmem:[%s3132_s22 + $0x180] sm:$0xff] }
  0x31   : > { %345 = vst [vmem:[%s3137_s18 + $0xb0] sm:$0xff] %v344_v22  ;;  %347 = vst [vmem:[%s3137_s18 + $0xb8] sm:$0xff] %v346_v23  ;;  %v350_v25 = vld [vmem:[%s3132_s22 + $0x188] sm:$0xff]  ;;  %v352_v26 = vld [vmem:[%s3132_s22 + $0x190] sm:$0xff] }
  0x32   : > { %349 = vst [vmem:[%s3137_s18 + $0xc0] sm:$0xff] %v348_v24  ;;  %351 = vst [vmem:[%s3137_s18 + $0xc8] sm:$0xff] %v350_v25  ;;  %v354_v27 = vld [vmem:[%s3132_s22 + $0x198] sm:$0xff]  ;;  %v356_v28 = vld [vmem:[%s3132_s22 + $0x1c0] sm:$0xff] }
  0x33   : > { %353 = vst [vmem:[%s3137_s18 + $0xd0] sm:$0xff] %v352_v26  ;;  %v358_v29 = vld [vmem:[%s3132_s22 + $0x1c8] sm:$0xff]  ;;  %355 = vst [vmem:[%s3137_s18 + $0xd8] sm:$0xff] %v354_v27  ;;  %v360_v30 = vld [vmem:[%s3132_s22 + $0x1d0] sm:$0xff] }
  0x34   : > { %357 = vst [vmem:[%s3137_s18 + $0xe0] sm:$0xff] %v356_v28  ;;  %359 = vst [vmem:[%s3137_s18 + $0xe8] sm:$0xff] %v358_v29  ;;  %v362_v31 = vld [vmem:[%s3132_s22 + $0x1d8] sm:$0xff]  ;;  %v364_v32 = vld [vmem:[%s3132_s22 + $0x200] sm:$0xff] }
  0x35   : > { %361 = vst [vmem:[%s3137_s18 + $0xf0] sm:$0xff] %v360_v30  ;;  %363 = vst [vmem:[%s3137_s18 + $0xf8] sm:$0xff] %v362_v31  ;;  %v366_v33 = vld [vmem:[%s3132_s22 + $0x208] sm:$0xff]  ;;  %v368_v34 = vld [vmem:[%s3132_s22 + $0x210] sm:$0xff] }
  0x36   : > { %365 = vst [vmem:[%s3137_s18 + $0x100] sm:$0xff] %v364_v32  ;;  %v370_v35 = vld [vmem:[%s3132_s22 + $0x218] sm:$0xff]  ;;  %367 = vst [vmem:[%s3137_s18 + $0x108] sm:$0xff] %v366_v33  ;;  %v372_v36 = vld [vmem:[%s3132_s22 + $0x240] sm:$0xff] }
  0x37   : > { %369 = vst [vmem:[%s3137_s18 + $0x110] sm:$0xff] %v368_v34  ;;  %371 = vst [vmem:[%s3137_s18 + $0x118] sm:$0xff] %v370_v35  ;;  %v374_v37 = vld [vmem:[%s3132_s22 + $0x248] sm:$0xff]  ;;  %v376_v38 = vld [vmem:[%s3132_s22 + $0x250] sm:$0xff] }
  0x38   : > { %373 = vst [vmem:[%s3137_s18 + $0x120] sm:$0xff] %v372_v36  ;;  %375 = vst [vmem:[%s3137_s18 + $0x128] sm:$0xff] %v374_v37  ;;  %v378_v39 = vld [vmem:[%s3132_s22 + $0x258] sm:$0xff]  ;;  %v380_v40 = vld [vmem:[%s3132_s22 + $0x280] sm:$0xff] }
  0x39   : > { %377 = vst [vmem:[%s3137_s18 + $0x130] sm:$0xff] %v376_v38  ;;  %v382_v41 = vld [vmem:[%s3132_s22 + $0x288] sm:$0xff]  ;;  %379 = vst [vmem:[%s3137_s18 + $0x138] sm:$0xff] %v378_v39  ;;  %v384_v42 = vld [vmem:[%s3132_s22 + $0x290] sm:$0xff] }
  0x3a   : > { %381 = vst [vmem:[%s3137_s18 + $0x140] sm:$0xff] %v380_v40  ;;  %383 = vst [vmem:[%s3137_s18 + $0x148] sm:$0xff] %v382_v41  ;;  %v386_v43 = vld [vmem:[%s3132_s22 + $0x298] sm:$0xff]  ;;  %v388_v44 = vld [vmem:[%s3132_s22 + $0x2c0] sm:$0xff] }
  0x3b   : > { %385 = vst [vmem:[%s3137_s18 + $0x150] sm:$0xff] %v384_v42  ;;  %387 = vst [vmem:[%s3137_s18 + $0x158] sm:$0xff] %v386_v43  ;;  %v390_v45 = vld [vmem:[%s3132_s22 + $0x2c8] sm:$0xff]  ;;  %v392_v46 = vld [vmem:[%s3132_s22 + $0x2d0] sm:$0xff] }
  0x3c   : > { %389 = vst [vmem:[%s3137_s18 + $0x160] sm:$0xff] %v388_v44  ;;  %v394_v47 = vld [vmem:[%s3132_s22 + $0x2d8] sm:$0xff]  ;;  %391 = vst [vmem:[%s3137_s18 + $0x168] sm:$0xff] %v390_v45  ;;  %v396_v48 = vld [vmem:[%s3132_s22 + $0x300] sm:$0xff] }
  0x3d   : > { %393 = vst [vmem:[%s3137_s18 + $0x170] sm:$0xff] %v392_v46  ;;  %395 = vst [vmem:[%s3137_s18 + $0x178] sm:$0xff] %v394_v47  ;;  %v398_v49 = vld [vmem:[%s3132_s22 + $0x308] sm:$0xff]  ;;  %v400_v50 = vld [vmem:[%s3132_s22 + $0x310] sm:$0xff] }
  0x3e   : > { %397 = vst [vmem:[%s3137_s18 + $0x180] sm:$0xff] %v396_v48  ;;  %399 = vst [vmem:[%s3137_s18 + $0x188] sm:$0xff] %v398_v49  ;;  %v402_v51 = vld [vmem:[%s3132_s22 + $0x318] sm:$0xff]  ;;  %v404_v52 = vld [vmem:[%s3132_s22 + $0x340] sm:$0xff] }
  0x3f   : > { %401 = vst [vmem:[%s3137_s18 + $0x190] sm:$0xff] %v400_v50  ;;  %v406_v53 = vld [vmem:[%s3132_s22 + $0x348] sm:$0xff]  ;;  %403 = vst [vmem:[%s3137_s18 + $0x198] sm:$0xff] %v402_v51  ;;  %v408_v54 = vld [vmem:[%s3132_s22 + $0x350] sm:$0xff] }
  0x40   : > { %405 = vst [vmem:[%s3137_s18 + $0x1a0] sm:$0xff] %v404_v52  ;;  %407 = vst [vmem:[%s3137_s18 + $0x1a8] sm:$0xff] %v406_v53  ;;  %v410_v55 = vld [vmem:[%s3132_s22 + $0x358] sm:$0xff]  ;;  %v412_v56 = vld [vmem:[%s3132_s22 + $0x380] sm:$0xff] }
  0x41   : > { %409 = vst [vmem:[%s3137_s18 + $0x1b0] sm:$0xff] %v408_v54  ;;  %411 = vst [vmem:[%s3137_s18 + $0x1b8] sm:$0xff] %v410_v55  ;;  %v414_v57 = vld [vmem:[%s3132_s22 + $0x388] sm:$0xff]  ;;  %v416_v58 = vld [vmem:[%s3132_s22 + $0x390] sm:$0xff] }
  0x42   : > { %413 = vst [vmem:[%s3137_s18 + $0x1c0] sm:$0xff] %v412_v56  ;;  %v418_v59 = vld [vmem:[%s3132_s22 + $0x398] sm:$0xff]  ;;  %415 = vst [vmem:[%s3137_s18 + $0x1c8] sm:$0xff] %v414_v57  ;;  %v420_v60 = vld [vmem:[%s3132_s22 + $0x3c0] sm:$0xff] }
  0x43   : > { %417 = vst [vmem:[%s3137_s18 + $0x1d0] sm:$0xff] %v416_v58  ;;  %419 = vst [vmem:[%s3137_s18 + $0x1d8] sm:$0xff] %v418_v59  ;;  %v422_v61 = vld [vmem:[%s3132_s22 + $0x3c8] sm:$0xff]  ;;  %v424_v62 = vld [vmem:[%s3132_s22 + $0x3d0] sm:$0xff] }
  0x44   : > { %421 = vst [vmem:[%s3137_s18 + $0x1e0] sm:$0xff] %v420_v60  ;;  %423 = vst [vmem:[%s3137_s18 + $0x1e8] sm:$0xff] %v422_v61  ;;  %v426_v63 = vld [vmem:[%s3132_s22 + $0x3d8] sm:$0xff] }
  0x45   : > { %425 = vst [vmem:[%s3137_s18 + $0x1f0] sm:$0xff] %v424_v62  ;;  %427 = vst [vmem:[%s3137_s18 + $0x1f8] sm:$0xff] %v426_v63 }
  0x46 PF: > { %p2584_p12 = scmp.ge.s32.totalorder %s2994_s12, 1  ;;  %p444_p13 = scmp.lt.s32.totalorder %s2994_s12, 5 }
  0x48   : > { %p445_p0 = pnand %p2584_p12, %p444_p13 }
  0x49   : > { %s4241_s15 = sand.u32 (!%p445_p0), 1, %s2970_s28   ;;  %s2996_s25 = smov (!%p445_p0), 1   ;;  %v3323_v48 = vld [vmem:[%s4232_s2] sm:$0xff] (!%p445_p0)   ;;  %v2997_v52 = vmov (!%p445_p0), 0   ;;  %vm721_vm0 = vcmask (!%p445_p0), 7168  }
  0x4a   : > { %448 = sbr.rel (%p445_p0) target bundleno = 1272 (0x4f8), region = 71  ;;  %s3269_s16 = sshll.u32 (!%p445_p0), %s4241_s15, 9  ;;  %899 = vmatprep.mubr.bf16.mxu1 (!%p445_p0), %v2997_v52  ;;  %2704 = vmatprep.mubr.bf16.mxu0 (!%p445_p0), %v3323_v48 }
  0x4b   : > { %s3272_s23 = scalar_lea.vmem (!%p445_p0), [#allocation2], %s3269_s16  ;;  %2818 = vset.pattern.permute.xlu0 (!%p445_p0), %v2997_v52  ;;  %2819 = vset.pattern.permute.xlu1 (!%p445_p0), %v2997_v52  ;;  %p494_p1 = scmp.lt.s32.totalorder (!%p445_p0), %s2982_s9, 1 }
  0x4c   : > { %v537_v0 = vld [vmem:[%s3272_s23 + $0x40] sm:$0xff] (!%p445_p0)  ;;  %v538_v5 = vld [vmem:[%s3272_s23 + $0x48] sm:$0xff] (!%p445_p0)  ;;  %v532_v46 = vld [vmem:[%s3272_s23 + $0x18] sm:$0xff] (!%p445_p0)  ;;  %p496_p2 = scmp.lt.s32.totalorder (!%p445_p0), %s2978_s30, 1  ;;  %s2592_s11 = sshll.u32 (!%p445_p0), %s2978_s30, 9 }
  0x4d   : > { %v541_v1 = vld [vmem:[%s3272_s23 + $0x60] sm:$0xff] (!%p445_p0)  ;;  %v542_v6 = vld [vmem:[%s3272_s23 + $0x68] sm:$0xff] (!%p445_p0)  ;;  %v536_v47 = vld [vmem:[%s3272_s23 + $0x38] sm:$0xff] (!%p445_p0)  ;;  %s2999_s15 = smov (!%p445_p0), 126  }
  0x4e   : > { %v529_v2 = vld [vmem:[%s3272_s23] sm:$0xff] (!%p445_p0)  ;;  %v597_v3 = vpack.c.bf16 (!%p445_p0), %v541_v1, %v537_v0  ;;  %v530_v8 = vld [vmem:[%s3272_s23 + $0x8] sm:$0xff] (!%p445_p0)  ;;  %v598_v10 = vpack.c.bf16 (!%p445_p0), %v542_v6, %v538_v5  ;;  %v531_v50 = vld [vmem:[%s3272_s23 + $0x10] sm:$0xff] (!%p445_p0)  ;;  %v596_v56 = vpack.c.bf16 (!%p445_p0), %v536_v47, %v532_v46 }
  0x4f   : > { %v533_v4 = vld [vmem:[%s3272_s23 + $0x20] sm:$0xff] (!%p445_p0)  ;;  %v534_v9 = vld [vmem:[%s3272_s23 + $0x28] sm:$0xff] (!%p445_p0)  ;;  %v535_v51 = vld [vmem:[%s3272_s23 + $0x30] sm:$0xff] (!%p445_p0) }
  0x50   : > { %v593_v7 = vpack.c.bf16 (!%p445_p0), %v533_v4, %v529_v2  ;;  %665 = vrot.lane.b32.xlu1 (!%p445_p0), %v597_v3, %s2996_s25  ;;  %v594_v11 = vpack.c.bf16 (!%p445_p0), %v534_v9, %v530_v8  ;;  %v546_v12 = vld [vmem:[%s3272_s23 + $0x88] sm:$0xff] (!%p445_p0)  ;;  %v545_v14 = vld [vmem:[%s3272_s23 + $0x80] sm:$0xff] (!%p445_p0)  ;;  %v540_v54 = vld [vmem:[%s3272_s23 + $0x58] sm:$0xff] (!%p445_p0)  ;;  %v595_v59 = vpack.c.bf16 (!%p445_p0), %v535_v51, %v531_v50 }
  0x51   : > { %v550_v13 = vld [vmem:[%s3272_s23 + $0xa8] sm:$0xff]  ;;  %v549_v15 = vld [vmem:[%s3272_s23 + $0xa0] sm:$0xff]  ;;  %v544_v55 = vld [vmem:[%s3272_s23 + $0x78] sm:$0xff]  ;;  %s497_s14 = scalar_select %p496_p2, %s2978_s30, 1 }
  0x52   : > { %657 = vrot.lane.b32.xlu0 %v593_v7, %s2996_s25  ;;  %v602_v16 = vpack.c.bf16 %v550_v13, %v546_v12  ;;  %v601_v17 = vpack.c.bf16 %v549_v15, %v545_v14  ;;  %v554_v18 = vld [vmem:[%s3272_s23 + $0xc8] sm:$0xff]  ;;  %v553_v20 = vld [vmem:[%s3272_s23 + $0xc0] sm:$0xff]  ;;  %v539_v57 = vld [vmem:[%s3272_s23 + $0x50] sm:$0xff]  ;;  %v600_v60 = vpack.c.bf16 %v544_v55, %v540_v54 }
  0x53   : > { %v558_v19 = vld [vmem:[%s3272_s23 + $0xe8] sm:$0xff]  ;;  %v557_v21 = vld [vmem:[%s3272_s23 + $0xe0] sm:$0xff]  ;;  %v543_v58 = vld [vmem:[%s3272_s23 + $0x70] sm:$0xff]  ;;  %s2587_s17 = sshll.u32 %s497_s14, 4  ;;  %s2674_s14 = sshll.u32 %s2982_s9, 7 }
  0x54   : > { %667 = vrot.lane.b32.xlu1 %v598_v10, %s2996_s25  ;;  %v606_v22 = vpack.c.bf16 %v558_v19, %v554_v18  ;;  %v605_v23 = vpack.c.bf16 %v557_v21, %v553_v20  ;;  %v562_v24 = vld [vmem:[%s3272_s23 + $0x108] sm:$0xff]  ;;  %v561_v26 = vld [vmem:[%s3272_s23 + $0x100] sm:$0xff]  ;;  %v599_v61 = vpack.c.bf16 %v543_v58, %v539_v57  ;;  %v548_v62 = vld [vmem:[%s3272_s23 + $0x98] sm:$0xff] }
  0x55   : > { %v566_v25 = vld [vmem:[%s3272_s23 + $0x128] sm:$0xff]  ;;  %v565_v27 = vld [vmem:[%s3272_s23 + $0x120] sm:$0xff]  ;;  %v552_v63 = vld [vmem:[%s3272_s23 + $0xb8] sm:$0xff] }
  0x56   : > { %659 = vrot.lane.b32.xlu0 %v594_v11, %s2996_s25  ;;  %v610_v28 = vpack.c.bf16 %v566_v25, %v562_v24  ;;  %v609_v29 = vpack.c.bf16 %v565_v27, %v561_v26  ;;  %v570_v30 = vld [vmem:[%s3272_s23 + $0x148] sm:$0xff]  ;;  %v569_v32 = vld [vmem:[%s3272_s23 + $0x140] sm:$0xff]  ;;  %v547_v0 = vld [vmem:[%s3272_s23 + $0x90] sm:$0xff]  ;;  %v604_v2 = vpack.c.bf16 %v552_v63, %v548_v62 }
  0x57   : > { %v574_v31 = vld [vmem:[%s3272_s23 + $0x168] sm:$0xff]  ;;  %v573_v33 = vld [vmem:[%s3272_s23 + $0x160] sm:$0xff]  ;;  %v551_v1 = vld [vmem:[%s3272_s23 + $0xb0] sm:$0xff] }
  0x58   : > { %675 = vrot.lane.b32.xlu1 %v602_v16, %s2996_s25  ;;  %v614_v34 = vpack.c.bf16 %v574_v31, %v570_v30  ;;  %v613_v35 = vpack.c.bf16 %v573_v33, %v569_v32  ;;  %v578_v36 = vld [vmem:[%s3272_s23 + $0x188] sm:$0xff]  ;;  %v577_v38 = vld [vmem:[%s3272_s23 + $0x180] sm:$0xff]  ;;  %v603_v3 = vpack.c.bf16 %v551_v1, %v547_v0  ;;  %v556_v4 = vld [vmem:[%s3272_s23 + $0xd8] sm:$0xff] }
  0x59   : > { %v582_v37 = vld [vmem:[%s3272_s23 + $0x1a8] sm:$0xff]  ;;  %v581_v39 = vld [vmem:[%s3272_s23 + $0x1a0] sm:$0xff]  ;;  %v560_v5 = vld [vmem:[%s3272_s23 + $0xf8] sm:$0xff] }
  0x5a   : > { %673 = vrot.lane.b32.xlu0 %v601_v17, %s2996_s25  ;;  %v618_v40 = vpack.c.bf16 %v582_v37, %v578_v36  ;;  %v617_v41 = vpack.c.bf16 %v581_v39, %v577_v38  ;;  %v586_v42 = vld [vmem:[%s3272_s23 + $0x1c8] sm:$0xff]  ;;  %v585_v44 = vld [vmem:[%s3272_s23 + $0x1c0] sm:$0xff]  ;;  %v555_v6 = vld [vmem:[%s3272_s23 + $0xd0] sm:$0xff]  ;;  %v608_v8 = vpack.c.bf16 %v560_v5, %v556_v4 }
  0x5b   : > { %v590_v43 = vld [vmem:[%s3272_s23 + $0x1e8] sm:$0xff]  ;;  %v589_v45 = vld [vmem:[%s3272_s23 + $0x1e0] sm:$0xff]  ;;  %v559_v7 = vld [vmem:[%s3272_s23 + $0xf0] sm:$0xff] }
  0x5c   : > { %683 = vrot.lane.b32.xlu1 %v606_v22, %s2996_s25  ;;  %v622_v49 = vpack.c.bf16 %v590_v43, %v586_v42  ;;  %v621_v53 = vpack.c.bf16 %v589_v45, %v585_v44  ;;  %v607_v9 = vpack.c.bf16 %v559_v7, %v555_v6  ;;  %v564_v10 = vld [vmem:[%s3272_s23 + $0x118] sm:$0xff]  ;;  %v563_v12 = vld [vmem:[%s3272_s23 + $0x110] sm:$0xff]  ;;  %v833_v36 = vld [vmem:[%s4233_s3 + $0x10] sm:$0xff] }
  0x5d   : > { %v568_v11 = vld [vmem:[%s3272_s23 + $0x138] sm:$0xff]  ;;  %v567_v13 = vld [vmem:[%s3272_s23 + $0x130] sm:$0xff]  ;;  %v834_v37 = vld [vmem:[%s4233_s3 + $0x18] sm:$0xff] }
  0x5e   : > { %681 = vrot.lane.b32.xlu0 %v605_v23, %s2996_s25  ;;  %v612_v14 = vpack.c.bf16 %v568_v11, %v564_v10  ;;  %v611_v15 = vpack.c.bf16 %v567_v13, %v563_v12  ;;  %v572_v16 = vld [vmem:[%s3272_s23 + $0x158] sm:$0xff]  ;;  %v571_v18 = vld [vmem:[%s3272_s23 + $0x150] sm:$0xff] }
  0x5f   : > { %v576_v17 = vld [vmem:[%s3272_s23 + $0x178] sm:$0xff]  ;;  %v575_v19 = vld [vmem:[%s3272_s23 + $0x170] sm:$0xff] }
  0x60   : > { %691 = vrot.lane.b32.xlu1 %v610_v28, %s2996_s25  ;;  %v616_v20 = vpack.c.bf16 %v576_v17, %v572_v16  ;;  %v615_v21 = vpack.c.bf16 %v575_v19, %v571_v18  ;;  %v580_v22 = vld [vmem:[%s3272_s23 + $0x198] sm:$0xff]  ;;  %v579_v24 = vld [vmem:[%s3272_s23 + $0x190] sm:$0xff] }
  0x61   : > { %v584_v23 = vld [vmem:[%s3272_s23 + $0x1b8] sm:$0xff]  ;;  %v583_v25 = vld [vmem:[%s3272_s23 + $0x1b0] sm:$0xff] }
  0x62   : > { %689 = vrot.lane.b32.xlu0 %v609_v29, %s2996_s25  ;;  %v620_v26 = vpack.c.bf16 %v584_v23, %v580_v22  ;;  %v619_v27 = vpack.c.bf16 %v583_v25, %v579_v24  ;;  %v588_v28 = vld [vmem:[%s3272_s23 + $0x1d8] sm:$0xff]  ;;  %v587_v30 = vld [vmem:[%s3272_s23 + $0x1d0] sm:$0xff] }
  0x63   : > { %v592_v29 = vld [vmem:[%s3272_s23 + $0x1f8] sm:$0xff]  ;;  %v591_v31 = vld [vmem:[%s3272_s23 + $0x1f0] sm:$0xff] }
  0x64   : > { %699 = vrot.lane.b32.xlu1 %v614_v34, %s2996_s25  ;;  %v624_v32 = vpack.c.bf16 %v592_v29, %v588_v28  ;;  %v623_v33 = vpack.c.bf16 %v591_v31, %v587_v30  ;;  %v831_v34 = vld [vmem:[%s4233_s3] sm:$0xff] }
  0x66   : > { %697 = vrot.lane.b32.xlu0 %v613_v35, %s2996_s25  ;;  %v832_v35 = vld [vmem:[%s4233_s3 + $0x8] sm:$0xff] }
  0x68   : > { %707 = vrot.lane.b32.xlu1 %v618_v40, %s2996_s25 }
  0x6a   : > { %705 = vrot.lane.b32.xlu0 %v617_v41, %s2996_s25 }
  0x6c   : > { %715 = vrot.lane.b32.xlu1 %v622_v49, %s2996_s25 }
  0x6e   : > { %713 = vrot.lane.b32.xlu0 %v621_v53, %s2996_s25 }
  0x70   : > { %663 = vrot.lane.b32.xlu1 %v596_v56, %s2996_s25 }
  0x72   : > { %661 = vrot.lane.b32.xlu0 %v595_v59, %s2996_s25 }
  0x74   : > { %671 = vrot.lane.b32.xlu1 %v600_v60, %s2996_s25 }
  0x76   : > { %669 = vrot.lane.b32.xlu0 %v599_v61, %s2996_s25 }
  0x78   : > { %679 = vrot.lane.b32.xlu1 %v604_v2, %s2996_s25 }
  0x7a   : > { %677 = vrot.lane.b32.xlu0 %v603_v3, %s2996_s25 }
  0x7c   : > { %687 = vrot.lane.b32.xlu1 %v608_v8, %s2996_s25 }
  0x7e   : > { %685 = vrot.lane.b32.xlu0 %v607_v9, %s2996_s25 }
  0x80   : > { %695 = vrot.lane.b32.xlu1 %v612_v14, %s2996_s25 }
  0x82   : > { %693 = vrot.lane.b32.xlu0 %v611_v15, %s2996_s25 }
  0x84   : > { %703 = vrot.lane.b32.xlu1 %v616_v20, %s2996_s25 }
  0x86   : > { %701 = vrot.lane.b32.xlu0 %v615_v21, %s2996_s25 }
  0x88   : > { %711 = vrot.lane.b32.xlu1 %v620_v26, %s2996_s25 }
  0x8a   : > { %709 = vrot.lane.b32.xlu0 %v619_v27, %s2996_s25 }
  0x8c   : > { %719 = vrot.lane.b32.xlu1 %v624_v32, %s2996_s25 }
  0x8e   : > { %717 = vrot.lane.b32.xlu0 %v623_v33, %s2996_s25  ;;  %s495_s25 = scalar_select %p494_p1, %s2982_s9, 1 }
  0x90   : > { %842 = vperm.xlu1 %2819, %v832_v35   ;;  %s2588_s0 = sshll.u32 %s495_s25, 5  ;;  %s3954_s25 = scalar_lea.vmem [#allocation3], %s3269_s16 }
  0x91   : > { %s500_s21 = sadd.s32 %s2588_s0, %s2587_s17  ;;  %s2673_s16 = sshll.u32 %s2978_s30, 2 }
  0x92   : > { %837 = vperm.xlu0 %2818, %v831_v34   ;;  %s2589_s22 = sshll.u32 %s500_s21, 3  ;;  %s2467_s17 = sadd.s32 %s2674_s14, %s2673_s16 }
  0x93   : > { %s3398_s24 = scalar_lea.vmem %s4231_s1, %s2589_s22  ;;  %s2675_s30 = sshll.u32 %s2467_s17, 7 }
  0x94   : > { %847 = vperm.xlu1 %2819, %v833_v36   ;;  %v505_v39 = vld [vmem:[%s3398_s24] sm:$0xff]  ;;  %v506_v40 = vld [vmem:[%s3398_s24 + $0x8] sm:$0xff]  ;;  %v507_v44 = vld [vmem:[%s3398_s24 + $0x10] sm:$0xff]  ;;  %s2470_s9 = sshll.u32 %s3954_s25, 4  ;;  %s4168_s0 = scalar_lea.hbm %s4238_s8, %s2675_s30  ;;  %s4171_s9 = int_to_ptr.vmem [resolvable:$true] %s2470_s9 }
  0x95   : > { %v3402_v42 = vpack.c.bf16 %v506_v40, %v505_v39  ;;  %v508_v45 = vld [vmem:[%s3398_s24 + $0x18] sm:$0xff]  ;;  %v509_v49 = vld [vmem:[%s3398_s24 + $0x20] sm:$0xff]  ;;  %v510_v50 = vld [vmem:[%s3398_s24 + $0x28] sm:$0xff] }
  0x96   : > { %852 = vperm.xlu0 %2818, %v834_v37   ;;  %v3416_v53 = vpack.c.bf16 %v508_v45, %v507_v44  ;;  %v3422_v57 = vpack.c.bf16 %v510_v50, %v509_v49  ;;  %v511_v59 = vld [vmem:[%s3398_s24 + $0x30] sm:$0xff]  ;;  %v512_v60 = vld [vmem:[%s3398_s24 + $0x38] sm:$0xff]  ;;  %v513_v3 = vld [vmem:[%s3398_s24 + $0x40] sm:$0xff] }
  0x97   : > { %v3434_v1 = vpack.c.bf16 %v512_v60, %v511_v59  ;;  %v514_v4 = vld [vmem:[%s3398_s24 + $0x48] sm:$0xff]  ;;  %v515_v10 = vld [vmem:[%s3398_s24 + $0x50] sm:$0xff]  ;;  %v516_v11 = vld [vmem:[%s3398_s24 + $0x58] sm:$0xff] }
  0x98   : > { %v3444_v8 = vpack.c.bf16 %v514_v4, %v513_v3  ;;  %v3454_v15 = vpack.c.bf16 %v516_v11, %v515_v10  ;;  %v517_v17 = vld [vmem:[%s3398_s24 + $0x60] sm:$0xff]  ;;  %v518_v18 = vld [vmem:[%s3398_s24 + $0x68] sm:$0xff]  ;;  %v519_v24 = vld [vmem:[%s3398_s24 + $0x70] sm:$0xff]  ;;  %v1082_v11 = vlaneseq }
  0x99   : > { %v3464_v22 = vpack.c.bf16 %v518_v18, %v517_v17  ;;  %v520_v25 = vld [vmem:[%s3398_s24 + $0x78] sm:$0xff]  ;;  %s2998_s24 = smov 127  }
  0x9a   : > { %v3474_v29 = vpack.c.bf16 %v520_v25, %v519_v24 }
  0xc2   : > { %v666_v38 = vpop.permute.xlu1 %665 }
  0xc3   : > { %v777_v61 = vsel %vm721_vm0, %v3416_v53, %v666_v38 }
  0xc4   : > { %v658_v41 = vpop.permute.xlu0 %657 }
  0xc5   : > { %v773_v51 = vsel %vm721_vm0, %v3402_v42, %v658_v41 }
  0xc6   : > { %v3404_v43 = vpop.permute.xlu1 %667 }
  0xc7   : > { %v725_v55 = vsel %vm721_vm0, %v666_v38, %v3404_v43 }
  0xc8   : > { %v3408_v46 = vpop.permute.xlu0 %659 }
  0xc9   : > { %v722_v47 = vsel %vm721_vm0, %v658_v41, %v3408_v46 }
  0xca   : > { %867 = vmatprep.subr.bf16.mxu1 %v722_v47  ;;  %v3418_v54 = vpop.permute.xlu1 %675 }
  0xcb   : > { %868 = vmatpush1.bf16.msra.mxu1 %v773_v51 }
  0xcc   : > { %869 = vmatprep.subr.bf16.mxu1 %v725_v55  ;;  %v674_v56 = vpop.permute.xlu0 %673 }
  0xcd   : > { %v728_v58 = vsel %vm721_vm0, %v674_v56, %v3418_v54  ;;  %v781_v0 = vsel %vm721_vm0, %v3422_v57, %v674_v56 }
  0xce   : > { %v3430_v62 = vpop.permute.xlu1 %683 }
  0xcf   : > { %870 = vmatpush1.bf16.msra.mxu1 %v777_v61 }
  0xd0   : > { %v682_v63 = vpop.permute.xlu0 %681  ;;  %871 = vmatprep.subr.bf16.mxu1 %v728_v58 }
  0xd1   : > { %v731_v2 = vsel %vm721_vm0, %v682_v63, %v3430_v62  ;;  %v785_v7 = vsel %vm721_vm0, %v3434_v1, %v682_v63 }
  0xd2   : > { %v3440_v5 = vpop.permute.xlu1 %691 }
  0xd3   : > { %872 = vmatpush1.bf16.msra.mxu1 %v781_v0 }
  0xd4   : > { %v690_v6 = vpop.permute.xlu0 %689  ;;  %873 = vmatprep.subr.bf16.mxu1 %v731_v2 }
  0xd5   : > { %v734_v9 = vsel %vm721_vm0, %v690_v6, %v3440_v5  ;;  %v789_v14 = vsel %vm721_vm0, %v3444_v8, %v690_v6 }
  0xd6   : > { %v3450_v12 = vpop.permute.xlu1 %699 }
  0xd7   : > { %874 = vmatpush1.bf16.msra.mxu1 %v785_v7 }
  0xd8   : > { %v698_v13 = vpop.permute.xlu0 %697  ;;  %875 = vmatprep.subr.bf16.mxu1 %v734_v9 }
  0xd9   : > { %v737_v16 = vsel %vm721_vm0, %v698_v13, %v3450_v12  ;;  %v793_v21 = vsel %vm721_vm0, %v3454_v15, %v698_v13  ;;  %v3533_v13 = vstv %s2592_s11  ;;  %s2900_s11 = scalar_lea.vmem %s4171_s9, 8192 }
  0xda   : > { %v3460_v19 = vpop.permute.xlu1 %707  ;;  %p2901_p3 = scmp.ne.s32.totalorder %s4171_s9, %s2900_s11 }
  0xdb   : > { %876 = vmatpush1.bf16.msra.mxu1 %v789_v14 }
  0xdc   : > { %v706_v20 = vpop.permute.xlu0 %705  ;;  %877 = vmatprep.subr.bf16.mxu1 %v737_v16  ;;  %p2902_p4 = pnand %p2901_p3, %p3109_p8 }
  0xdd   : > { %v740_v23 = vsel %vm721_vm0, %v706_v20, %v3460_v19  ;;  %v797_v28 = vsel %vm721_vm0, %v3464_v22, %v706_v20 }
  0xde   : > { %v3470_v26 = vpop.permute.xlu1 %715  ;;  %p2903_p5 = pneg %p2902_p4 }
  0xdf   : > { %878 = vmatpush1.bf16.msra.mxu1 %v793_v21 }
  0xe0   : > { %v714_v27 = vpop.permute.xlu0 %713  ;;  %879 = vmatprep.subr.bf16.mxu1 %v740_v23 }
  0xe1   : > { %v743_v30 = vsel %vm721_vm0, %v714_v27, %v3470_v26  ;;  %v801_v34 = vsel %vm721_vm0, %v3474_v29, %v714_v27 }
  0xe2   : > { %v664_v31 = vpop.permute.xlu1 %663 }
  0xe3   : > { %880 = vmatpush1.bf16.msra.mxu1 %v797_v28  ;;  %v804_v33 = vsel %vm721_vm0, %v664_v31, %v3402_v42 }
  0xe4   : > { %v662_v32 = vpop.permute.xlu0 %661  ;;  %881 = vmatprep.subr.bf16.mxu1 %v743_v30  ;;  %2688 = vmatprep.subr.bf16.mxu0 %v804_v33  ;;  %v2824_v30 = vld [vmem:[%s4234_s4] sm:$0xff]  }
  0xe5   : > { %v724_v35 = vsel %vm721_vm0, %v662_v32, %v664_v31  ;;  %2689 = vmatpush3.bf16.msra.mxu0 %v804_v33  ;;  %v723_v40 = vsel %vm721_vm0, %v3408_v46, %v662_v32  ;;  %v2821_v46 = vld [vmem:[%s4232_s2 + $0x8] sm:$0xff]  }
  0xe6   : > { %v672_v36 = vpop.permute.xlu1 %671 }
  0xe7   : > { %882 = vmatpush1.bf16.msra.mxu1 %v801_v34  ;;  %v807_v38 = vsel %vm721_vm0, %v672_v36, %v3416_v53 }
  0xe8   : > { %v670_v37 = vpop.permute.xlu0 %669  ;;  %920 = vmatprep.subr.bf16.mxu1 %v724_v35  ;;  %2690 = vmatprep.subr.bf16.mxu0 %v807_v38 }
  0xe9   : > { %v727_v39 = vsel %vm721_vm0, %v670_v37, %v672_v36  ;;  %2691 = vmatpush3.bf16.msra.mxu0 %v807_v38  ;;  %v726_v47 = vsel %vm721_vm0, %v3404_v43, %v670_v37 }
  0xea   : > { %900 = vmatmul.mubr.bf16.vlgmr.msra.gmra.mrb[0].mxu1 %v3323_v48  ;;  %v680_v41 = vpop.permute.xlu1 %679 }
  0xeb   : > { %921 = vmatpush1.bf16.msra.mxu1 %v723_v40  ;;  %909 = vmatprep.mubr.bf16.mxu1 %v2997_v52  ;;  %v810_v44 = vsel %vm721_vm0, %v680_v41, %v3422_v57 }
  0xec   : > { %v678_v42 = vpop.permute.xlu0 %677  ;;  %922 = vmatprep.subr.bf16.mxu1 %v727_v39  ;;  %2692 = vmatprep.subr.bf16.mxu0 %v810_v44 }
  0xed   : > { %v730_v45 = vsel %vm721_vm0, %v678_v42, %v680_v41  ;;  %2693 = vmatpush3.bf16.msra.mxu0 %v810_v44  ;;  %v729_v55 = vsel %vm721_vm0, %v3418_v54, %v678_v42 }
  0xee   : > { %v688_v49 = vpop.permute.xlu1 %687 }
  0xef   : > { %923 = vmatpush1.bf16.msra.mxu1 %v726_v47  ;;  %v813_v51 = vsel %vm721_vm0, %v688_v49, %v3434_v1 }
  0xf0   : > { %v686_v50 = vpop.permute.xlu0 %685  ;;  %924 = vmatprep.subr.bf16.mxu1 %v730_v45  ;;  %2694 = vmatprep.subr.bf16.mxu0 %v813_v51 }
  0xf1   : > { %v733_v53 = vsel %vm721_vm0, %v686_v50, %v688_v49  ;;  %2695 = vmatpush3.bf16.msra.mxu0 %v813_v51  ;;  %v732_v59 = vsel %vm721_vm0, %v3430_v62, %v686_v50 }
  0xf2   : > { %910 = vmatmul.mubr.bf16.gmra.mrb[4].mxu1 %v2821_v46  ;;  %v696_v43 = vpop.permute.xlu1 %695 }
  0xf3   : > { %925 = vmatpush1.bf16.msra.mxu1 %v729_v55  ;;  %952 = vmatprep.mubr.bf16.mxu1 %v2997_v52  ;;  %v816_v57 = vsel %vm721_vm0, %v696_v43, %v3444_v8 }
  0xf4   : > { %v694_v56 = vpop.permute.xlu0 %693  ;;  %926 = vmatprep.subr.bf16.mxu1 %v733_v53  ;;  %2696 = vmatprep.subr.bf16.mxu0 %v816_v57 }
  0xf5   : > { %v736_v58 = vsel %vm721_vm0, %v694_v56, %v696_v43  ;;  %2697 = vmatpush3.bf16.msra.mxu0 %v816_v57  ;;  %v735_v0 = vsel %vm721_vm0, %v3440_v5, %v694_v56 }
  0xf6   : > { %v704_v54 = vpop.permute.xlu1 %703 }
  0xf7   : > { %927 = vmatpush1.bf16.msra.mxu1 %v732_v59  ;;  %v819_v61 = vsel %vm721_vm0, %v704_v54, %v3454_v15 }
  0xf8   : > { %v702_v60 = vpop.permute.xlu0 %701  ;;  %928 = vmatprep.subr.bf16.mxu1 %v736_v58  ;;  %2698 = vmatprep.subr.bf16.mxu0 %v819_v61 }
  0xf9   : > { %v739_v63 = vsel %vm721_vm0, %v702_v60, %v704_v54  ;;  %2699 = vmatpush3.bf16.msra.mxu0 %v819_v61  ;;  %v738_v4 = vsel %vm721_vm0, %v3450_v12, %v702_v60  ;;  %v3530_v12 = vand.u32 127, %v1082_v11 }
  0xfa   : > { %v712_v1 = vpop.permute.xlu1 %711 }
  0xfb   : > { %929 = vmatpush1.bf16.msra.mxu1 %v735_v0  ;;  %v822_v62 = vsel %vm721_vm0, %v712_v1, %v3464_v22  ;;  %v1084_v14 = vadd.s32 128, %v3530_v12  ;;  %v1090_v15 = vadd.s32 %v3533_v13, %v3530_v12 }
  0xfc   : > { %v710_v2 = vpop.permute.xlu0 %709  ;;  %930 = vmatprep.subr.bf16.mxu1 %v739_v63  ;;  %2700 = vmatprep.subr.bf16.mxu0 %v822_v62 }
  0xfd   : > { %v742_v3 = vsel %vm721_vm0, %v710_v2, %v712_v1  ;;  %2701 = vmatpush3.bf16.msra.mxu0 %v822_v62  ;;  %v741_v9 = vsel %vm721_vm0, %v3460_v19, %v710_v2  ;;  %v1091_v16 = vadd.s32 %v3533_v13, %v1084_v14  ;;  %v2593_v17 = vadd.s32 4294967295, %v1090_v15 }
  0xfe   : > { %v720_v6 = vpop.permute.xlu1 %719  ;;  %v1086_v14 = vadd.s32 384, %v3530_v12 }
  0xff   : > { %931 = vmatpush1.bf16.msra.mxu1 %v738_v4  ;;  %v825_v5 = vsel %vm721_vm0, %v720_v6, %v3474_v29  ;;  %v2594_v18 = vadd.s32 4294967295, %v1091_v16  ;;  %vm1100_vm1 = vcmp.ge.s32.totalorder %v2593_v17, 0  ;;  %vm1105_vm2 = vcmp.lt.s32.totalorder %v2593_v17, 1024 }
 0x100   : > { %v718_v7 = vpop.permute.xlu0 %717  ;;  %932 = vmatprep.subr.bf16.mxu1 %v742_v3  ;;  %2702 = vmatprep.subr.bf16.mxu0 %v825_v5  ;;  %vm3547_vm7 = vmand %vm1100_vm1, %vm1105_vm2  ;;  %v1093_v17 = vadd.s32 %v3533_v13, %v1086_v14 }
 0x101   : > { %v745_v8 = vsel %vm721_vm0, %v718_v7, %v720_v6  ;;  %2703 = vmatpush3.bf16.msra.mxu0 %v825_v5  ;;  %v744_v10 = vsel %vm721_vm0, %v3470_v26, %v718_v7  ;;  %vm1101_vm3 = vcmp.ge.s32.totalorder %v2594_v18, 0  ;;  %vm1106_vm4 = vcmp.lt.s32.totalorder %v2594_v18, 1024 }
 0x102   : > { %vm3553_vm9 = vmand %vm1101_vm3, %vm1106_vm4  ;;  %v1087_v7 = vadd.s32 512, %v3530_v12  ;;  %v1085_v5 = vadd.s32 256, %v3530_v12 }
 0x103   : > { %933 = vmatpush1.bf16.msra.mxu1 %v741_v9 }
 0x104   : > { %934 = vmatprep.subr.bf16.mxu1 %v745_v8  ;;  %2705 = vmatmul.mubr.bf16.vlgmr.msra.gmra.mrb[0].mxu0 %v2821_v46  ;;  %v1094_v15 = vadd.s32 %v3533_v13, %v1087_v7  ;;  %v1092_v16 = vadd.s32 %v3533_v13, %v1085_v5 }
 0x105   : > { %1940 = vmatprep.mubr.bf16.mxu0 %v2997_v52 }
 0x106   : > { %v2597_v18 = vadd.s32 4294967295, %v1094_v15 }
 0x107   : > { %935 = vmatpush1.bf16.msra.mxu1 %v744_v10 }
 0x108   : > { %vm1104_vm15 = vcmp.ge.s32.totalorder %v2597_v18, 0  ;;  %vm1109_vm0 = vcmp.lt.s32.totalorder %v2597_v18, 1024 }
 0x10a   : > { %953 = vmatmul.mubr.bf16.vlgmr.msra.gmra.mrb[8].mxu1 %v3323_v48 }
 0x10b   : > { %962 = vmatprep.mubr.bf16.mxu1 %v2997_v52 }
 0x10f   : > { %v3541_v20 = vpop.permute.xlu1 %842 }
 0x111   : > { %v3539_v48 = vpop.permute.xlu0 %837 }
 0x112   : > { %963 = vmatmul.mubr.bf16.gmra.mrb[12].mxu1 %v2821_v46 }
 0x113   : > { %1260 = vmatprep.mubr.bf16.mxu1 %v2997_v52  ;;  %v3559_v36 = vpop.permute.xlu1 %847 }
 0x115   : > { %v3576_v45 = vpop.permute.xlu0 %852 }
 0x1bd   : > { %v901_v19 = vpop.f32.mrb[0].mxu1 }
 0x1be   : > { %v902_v21 = vadd.f32 %v901_v19, %v3539_v48  ;;  %v903_v22 = vpop.f32.mrb[1].mxu1  ;;  %v2595_v19 = vadd.s32 4294967295, %v1092_v16 }
 0x1bf   : > { %v904_v23 = vadd.f32 %v903_v22, %v3539_v48  ;;  %v905_v24 = vpop.f32.mrb[2].mxu1  ;;  %v2596_v22 = vadd.s32 4294967295, %v1093_v17 }
 0x1c0   : > { %v906_v25 = vadd.f32 %v905_v24, %v3541_v20  ;;  %vm1022_vm5 = vcmp.gt.f32.partialorder %v902_v21, 0.0  ;;  %v1042_v26 = vmul.f32 0.01, %v902_v21  ;;  %v907_v27 = vpop.f32.mrb[3].mxu1  ;;  %vm1102_vm1 = vcmp.ge.s32.totalorder %v2595_v19, 0 }
 0x1c1   : > { %vm1023_vm6 = vcmp.gt.f32.partialorder %v904_v23, 0.0  ;;  %v1043_v28 = vmul.f32 0.01, %v904_v23  ;;  %v908_v29 = vadd.f32 %v907_v27, %v3541_v20  ;;  %vm1107_vm3 = vcmp.lt.s32.totalorder %v2595_v19, 1024 }
 0x1c2   : > { %vm1027_vm8 = vcmp.gt.f32.partialorder %v906_v25, 0.0  ;;  %v1047_v31 = vmul.f32 0.01, %v906_v25  ;;  %v3551_v32 = vsel %vm1022_vm5, %v902_v21, %v1042_v26  ;;  %vm1103_vm5 = vcmp.ge.s32.totalorder %v2596_v22, 0 }
 0x1c3   : > { %v3557_v34 = vsel %vm1023_vm6, %v904_v23, %v1043_v28  ;;  %vm1028_vm10 = vcmp.gt.f32.partialorder %v908_v29, 0.0  ;;  %v1048_v35 = vmul.f32 0.01, %v908_v29  ;;  %v1125_v38 = vsel %vm3547_vm7, %v3551_v32, 0.0  ;;  %vm3633_vm6 = vmand %vm1104_vm15, %vm1109_vm0 }
 0x1c4   : > { %v3561_v37 = vsel %vm1027_vm8, %v906_v25, %v1047_v31  ;;  %v1126_v42 = vsel %vm3553_vm9, %v3557_v34, 0.0 }
 0x1c5   : > { %v2614_v39 = vpack.c.bf16 %v3561_v37, %v3551_v32  ;;  %v3568_v40 = vsel %vm1028_vm10, %v908_v29, %v1048_v35  ;;  %v1130_v41 = vsel %vm3547_vm7, %v3561_v37, 0.0  ;;  %v911_v44 = vpop.f32.mrb[4].mxu1  ;;  %vm1108_vm10 = vcmp.lt.s32.totalorder %v2596_v22, 1024 }
 0x1c6   : > { %v2611_v47 = vpack.c.bf16 %v3568_v40, %v3557_v34  ;;  %v3580_v46 = vpack.c.bf16 %v1130_v41, %v1125_v38  ;;  %v1131_v49 = vsel %vm3553_vm9, %v3568_v40, 0.0  ;;  %v913_v50 = vpop.f32.mrb[5].mxu1  ;;  %v912_v51 = vadd.f32 %v911_v44, %v3559_v36  ;;  %vm3653_vm15 = vmand %vm1103_vm5, %vm1108_vm10  ;;  %v2825_v34 = vld [vmem:[%s4234_s4 + $0x8] sm:$0xff]  }
 0x1c7   : > { %v3586_v53 = vpack.c.bf16 %v1131_v49, %v1126_v42  ;;  %v915_v55 = vpop.f32.mrb[6].mxu1  ;;  %v914_v43 = vadd.f32 %v913_v50, %v3559_v36  ;;  %vm2610_vm10 = vmpackc.low %vm3553_vm9, %vm3553_vm9 }
 0x1c8   : > { %1184 = vrot.lane.b32.xlu1 %v3580_v46, %s2998_s24  ;;  %v917_v56 = vpop.f32.mrb[7].mxu1  ;;  %v916_v57 = vadd.f32 %v915_v55, %v3576_v45  ;;  %vm1032_vm11 = vcmp.gt.f32.partialorder %v912_v51, 0.0  ;;  %v1052_v58 = vmul.f32 0.01, %v912_v51 }
 0x1c9   : > { %v918_v59 = vadd.f32 %v917_v56, %v3576_v45  ;;  %vm1033_vm12 = vcmp.gt.f32.partialorder %v914_v43, 0.0  ;;  %v1053_v54 = vmul.f32 0.01, %v914_v43 }
 0x1ca   : > { %vm1037_vm13 = vcmp.gt.f32.partialorder %v916_v57, 0.0  ;;  %v1057_v60 = vmul.f32 0.01, %v916_v57  ;;  %v3593_v61 = vsel %vm1032_vm11, %v912_v51, %v1052_v58 }
 0x1cb   : > { %vm1038_vm14 = vcmp.gt.f32.partialorder %v918_v59, 0.0  ;;  %v1058_v63 = vmul.f32 0.01, %v918_v59  ;;  %v3595_v0 = vsel %vm1033_vm12, %v914_v43, %v1053_v54  ;;  %v1135_v1 = vsel %vm3547_vm7, %v3593_v61, 0.0 }
 0x1cc   : > { %1186 = vrot.lane.b32.xlu1 %v3586_v53, %s2998_s24  ;;  %v1136_v2 = vsel %vm3553_vm9, %v3595_v0, 0.0  ;;  %v3605_v62 = vsel %vm1037_vm13, %v916_v57, %v1057_v60  ;;  %vm3646_vm13 = vmand %vm1102_vm1, %vm1107_vm3 }
 0x1cd   : > { %v3607_v3 = vsel %vm1038_vm14, %v918_v59, %v1058_v63  ;;  %v1140_v4 = vsel %vm3547_vm7, %v3605_v62, 0.0  ;;  %v2620_v6 = vpack.c.bf16 %v3605_v62, %v3593_v61 }
 0x1ce   : > { %v1141_v8 = vsel %vm3553_vm9, %v3607_v3, 0.0  ;;  %v2617_v9 = vpack.c.bf16 %v3607_v3, %v3595_v0  ;;  %v3621_v10 = vpack.c.bf16 %v1140_v4, %v1135_v1  ;;  %vm2624_vm9 = vmpackc.low %vm3653_vm15, %vm3653_vm15 }
 0x1cf   : > { %v3623_v11 = vpack.c.bf16 %v1141_v8, %v1136_v2  ;;  %v2826_v2 = vld [vmem:[%s4234_s4 + $0x20] sm:$0xff]  }
 0x1d7   : > { %v2706_v21 = vpop.f32.mrb[0].mxu0 }
 0x1d8   : > { %v1016_v23 = vadd.f32 %v2706_v21, %v3559_v36  ;;  %v1007_v24 = vpop.f32.mrb[1].mxu0 }
 0x1d9   : > { %v1008_v25 = vadd.f32 %v1007_v24, %v3539_v48  ;;  %v2707_v26 = vpop.f32.mrb[2].mxu0 }
 0x1da   : > { %vm1036_vm2 = vcmp.gt.f32.partialorder %v1016_v23, 0.0  ;;  %v1056_v12 = vmul.f32 0.01, %v1016_v23  ;;  %v1019_v27 = vadd.f32 %v2707_v26, %v3576_v45  ;;  %v1010_v28 = vpop.f32.mrb[3].mxu0 }
 0x1db   : > { %vm1026_vm4 = vcmp.gt.f32.partialorder %v1008_v25, 0.0  ;;  %v1046_v13 = vmul.f32 0.01, %v1008_v25  ;;  %v1011_v29 = vadd.f32 %v1010_v28, %v3541_v20 }
 0x1dc   : > { %v1076_v35 = vsel %vm1036_vm2, %v1016_v23, %v1056_v12  ;;  %vm1041_vm8 = vcmp.gt.f32.partialorder %v1019_v27, 0.0  ;;  %v1061_v38 = vmul.f32 0.01, %v1019_v27 }
 0x1dd   : > { %v954_v41 = vpop.f32.mrb[8].mxu1  ;;  %v1066_v42 = vsel %vm1026_vm4, %v1008_v25, %v1046_v13  ;;  %vm1031_vm11 = vcmp.gt.f32.partialorder %v1011_v29, 0.0  ;;  %v1051_v44 = vmul.f32 0.01, %v1011_v29  ;;  %v1139_v57 = vsel %vm3633_vm6, %v1076_v35, 0.0 }
 0x1de   : > { %v955_v49 = vadd.f32 %v954_v41, %v3539_v48  ;;  %v956_v50 = vpop.f32.mrb[9].mxu1  ;;  %v1081_v51 = vsel %vm1041_vm8, %v1019_v27, %v1061_v38  ;;  %v1129_v56 = vsel %vm3633_vm6, %v1066_v42, 0.0  ;;  %vm1221_vm8 = vcmask 261120  }
 0x1df   : > { %v957_v55 = vadd.f32 %v956_v50, %v3539_v48  ;;  %v958_v43 = vpop.f32.mrb[10].mxu1  ;;  %v1071_v58 = vsel %vm1031_vm11, %v1011_v29, %v1051_v44  ;;  %v1144_v18 = vsel %vm3633_vm6, %v1081_v51, 0.0  ;;  %vm2613_vm11 = vmpackc.low %vm3547_vm7, %vm3547_vm7 }
 0x1e0   : > { %vm1024_vm12 = vcmp.gt.f32.partialorder %v955_v49, 0.0  ;;  %v1044_v59 = vmul.f32 0.01, %v955_v49  ;;  %v959_v54 = vadd.f32 %v958_v43, %v3541_v20  ;;  %v960_v60 = vpop.f32.mrb[11].mxu1  ;;  %v1134_v4 = vsel %vm3633_vm6, %v1071_v58, 0.0  ;;  %vm2627_vm7 = vmpackc.low %vm3646_vm13, %vm3646_vm13 }
 0x1e1   : > { %vm1025_vm14 = vcmp.gt.f32.partialorder %v957_v55, 0.0  ;;  %v1045_v48 = vmul.f32 0.01, %v957_v55  ;;  %v961_v1 = vadd.f32 %v960_v60, %v3541_v20  ;;  %v1149_v8 = vpack.c.bf16 %v1134_v4, %v1129_v56  ;;  %v1749_v4 = vld [vmem:[%s4237_s7 + $0x8] sm:$0xff] }
 0x1e2   : > { %v3659_v7 = vsel %vm1024_vm12, %v955_v49, %v1044_v59  ;;  %vm1029_vm0 = vcmp.gt.f32.partialorder %v959_v54, 0.0  ;;  %v1049_v5 = vmul.f32 0.01, %v959_v54  ;;  %v1154_v24 = vpack.c.bf16 %v1144_v18, %v1139_v57  ;;  %v1755_v18 = vld [vmem:[%s4237_s7 + $0x38] sm:$0xff] }
 0x1e3   : > { %v3661_v14 = vsel %vm1025_vm14, %v957_v55, %v1045_v48  ;;  %vm1030_vm1 = vcmp.gt.f32.partialorder %v961_v1, 0.0  ;;  %v1050_v15 = vmul.f32 0.01, %v961_v1  ;;  %v1127_v20 = vsel %vm3646_vm13, %v3659_v7, 0.0 }
 0x1e4   : > { %v3663_v16 = vsel %vm1029_vm0, %v959_v54, %v1049_v5  ;;  %v1128_v17 = vsel %vm3653_vm15, %v3661_v14, 0.0  ;;  %v1750_v5 = vld [vmem:[%s4237_s7 + $0x10] sm:$0xff]  ;;  %vm1204_vm6 = vcmask 1039360   ;;  %vm1491_vm12 = vcmask 1031168  }
 0x1e5   : > { %v2628_v19 = vpack.c.bf16 %v3663_v16, %v3659_v7  ;;  %v3675_v21 = vsel %vm1030_vm1, %v961_v1, %v1050_v15  ;;  %v964_v22 = vpop.f32.mrb[12].mxu1  ;;  %v1132_v23 = vsel %vm3646_vm13, %v3663_v16, 0.0  ;;  %v1636_v1 = vld [vmem:[%s4235_s5] sm:$0xff] }
 0x1e6   : > { %v2625_v25 = vpack.c.bf16 %v3675_v21, %v3661_v14  ;;  %v965_v26 = vadd.f32 %v964_v22, %v3559_v36  ;;  %v966_v12 = vpop.f32.mrb[13].mxu1  ;;  %v1147_v27 = vpack.c.bf16 %v1132_v23, %v1127_v20  ;;  %v1133_v28 = vsel %vm3653_vm15, %v3675_v21, 0.0  ;;  %v1752_v15 = vld [vmem:[%s4237_s7 + $0x20] sm:$0xff]  ;;  %v1753_v20 = vld [vmem:[%s4237_s7 + $0x28] sm:$0xff] }
 0x1e7   : > { %v967_v13 = vadd.f32 %v966_v12, %v3559_v36  ;;  %v968_v29 = vpop.f32.mrb[14].mxu1  ;;  %v1148_v31 = vpack.c.bf16 %v1133_v28, %v1128_v17  ;;  %v1754_v17 = vld [vmem:[%s4237_s7 + $0x30] sm:$0xff]  ;;  %v1756_v22 = vld [vmem:[%s4237_s7 + $0x40] sm:$0xff]  ;;  %v1757_v23 = vld [vmem:[%s4237_s7 + $0x48] sm:$0xff] }
 0x1e8   : > { %vm1034_vm2 = vcmp.gt.f32.partialorder %v965_v26, 0.0  ;;  %v1054_v35 = vmul.f32 0.01, %v965_v26  ;;  %v969_v38 = vadd.f32 %v968_v29, %v3576_v45  ;;  %v970_v41 = vpop.f32.mrb[15].mxu1  ;;  %1188 = vrot.lane.b32.xlu0 %v1147_v27, %s2998_s24  ;;  %v1760_v12 = vld [vmem:[%s4237_s7 + $0x60] sm:$0xff]  ;;  %v1762_v28 = vld [vmem:[%s4237_s7 + $0x70] sm:$0xff] }
 0x1e9   : > { %vm1035_vm3 = vcmp.gt.f32.partialorder %v967_v13, 0.0  ;;  %v1055_v42 = vmul.f32 0.01, %v967_v13  ;;  %v971_v44 = vadd.f32 %v970_v41, %v3576_v45 }
 0x1ea   : > { %v3690_v49 = vsel %vm1034_vm2, %v965_v26, %v1054_v35  ;;  %vm1039_vm4 = vcmp.gt.f32.partialorder %v969_v38, 0.0  ;;  %v1059_v50 = vmul.f32 0.01, %v969_v38  ;;  %v1759_v26 = vld [vmem:[%s4237_s7 + $0x58] sm:$0xff] }
 0x1eb   : > { %v3692_v51 = vsel %vm1035_vm3, %v967_v13, %v1055_v42  ;;  %vm1040_vm5 = vcmp.gt.f32.partialorder %v971_v44, 0.0  ;;  %v1060_v36 = vmul.f32 0.01, %v971_v44  ;;  %v1137_v45 = vsel %vm3646_vm13, %v3690_v49, 0.0  ;;  %v1763_v13 = vld [vmem:[%s4237_s7 + $0x78] sm:$0xff] }
 0x1ec   : > { %v3694_v55 = vsel %vm1039_vm4, %v969_v38, %v1059_v50  ;;  %1196 = vrot.lane.b32.xlu0 %v3623_v11, %s2998_s24  ;;  %v1138_v54 = vsel %vm3653_vm15, %v3692_v51, 0.0 }
 0x1ed   : > { %v2634_v43 = vpack.c.bf16 %v3694_v55, %v3690_v49  ;;  %v3700_v56 = vsel %vm1040_vm5, %v971_v44, %v1060_v36  ;;  %v1142_v57 = vsel %vm3646_vm13, %v3694_v55, 0.0 }
 0x1ee   : > { %v2631_v58 = vpack.c.bf16 %v3700_v56, %v3692_v51  ;;  %v1152_v59 = vpack.c.bf16 %v1142_v57, %v1137_v45  ;;  %v1143_v60 = vsel %vm3653_vm15, %v3700_v56, 0.0  ;;  %v2822_v57 = vld [vmem:[%s4234_s4 + $0x10] sm:$0xff]  }
 0x1ef   : > { %v1153_v48 = vpack.c.bf16 %v1143_v60, %v1138_v54 }
 0x1f0   : > { %1198 = vrot.lane.b32.xlu1 %v1152_v59, %s2998_s24  ;;  %1194 = vrot.lane.b32.xlu0 %v3621_v10, %s2998_s24 }
 0x1f4   : > { %1190 = vrot.lane.b32.xlu1 %v1148_v31, %s2998_s24  ;;  %1192 = vrot.lane.b32.xlu0 %v1149_v8, %s2998_s24 }
 0x1f8   : > { %1200 = vrot.lane.b32.xlu1 %v1153_v48, %s2998_s24  ;;  %1202 = vrot.lane.b32.xlu0 %v1154_v24, %s2998_s24  ;;  %s3000_s24 = smov [#allocation3]  }
 0x1fc   : > { %1473 = vrot.lane.b32.xlu1 %v3586_v53, %s2999_s15  ;;  %1475 = vrot.lane.b32.xlu0 %v1147_v27, %s2999_s15  ;;  %v1637_v53 = vld [vmem:[%s4235_s5 + $0x8] sm:$0xff] }
 0x1fd   : > { %v1761_v27 = vld [vmem:[%s4237_s7 + $0x68] sm:$0xff] }
 0x200   : > { %1471 = vrot.lane.b32.xlu1 %v3580_v46, %s2999_s15  ;;  %1483 = vrot.lane.b32.xlu0 %v3623_v11, %s2999_s15  ;;  %v1638_v46 = vld [vmem:[%s4235_s5 + $0x10] sm:$0xff]  ;;  %v1748_v11 = vld [vmem:[%s4237_s7] sm:$0xff] }
 0x204   : > { %1485 = vrot.lane.b32.xlu1 %v1152_v59, %s2999_s15  ;;  %1481 = vrot.lane.b32.xlu0 %v3621_v10, %s2999_s15  ;;  %v1639_v10 = vld [vmem:[%s4235_s5 + $0x18] sm:$0xff] }
 0x208   : > { %1477 = vrot.lane.b32.xlu1 %v1148_v31, %s2999_s15  ;;  %1479 = vrot.lane.b32.xlu0 %v1149_v8, %s2999_s15  ;;  %v1751_v8 = vld [vmem:[%s4237_s7 + $0x18] sm:$0xff] }
 0x20c   : > { %1487 = vrot.lane.b32.xlu1 %v1153_v48, %s2999_s15  ;;  %1489 = vrot.lane.b32.xlu0 %v1154_v24, %s2999_s15  ;;  %v1758_v24 = vld [vmem:[%s4237_s7 + $0x50] sm:$0xff]  ;;  %s2904_s15 = sshll.u32 %s3000_s24, 4  ;;  %s2905_s15 = int_to_ptr.vmem [resolvable:$false] %s2904_s15 }
 0x20d   : > { %s2906_s18 = scalar_lea.vmem %s2905_s15, 16384  ;;  %p2907_p6 = scmp.lt.s32.totalorder %s4171_s9, %s2905_s15 }
 0x20e   : > { %p2908_p7 = scmp.lt.s32.totalorder %s2906_s18, %s2900_s11 }
 0x210   : > { %1642 = vperm.xlu1 %2819, %v1636_v1   ;;  %1647 = vperm.xlu0 %2818, %v1637_v53   ;;  %p2909_p10 = por %p2908_p7, %p2907_p6 }
 0x212   : > { %p2910_p11 = pnand %p2909_p10, %p2903_p5 }
 0x214   : > { %1652 = vperm.xlu1 %2819, %v1638_v46   ;;  %1657 = vperm.xlu0 %2818, %v1639_v10  }
 0x218   : > { %1766 = vperm.xlu1 %2819, %v1748_v11   ;;  %1771 = vperm.xlu0 %2818, %v1749_v4   ;;  %v2823_v11 = vld [vmem:[%s4234_s4 + $0x18] sm:$0xff]  }
 0x21c   : > { %1776 = vperm.xlu1 %2819, %v1750_v5   ;;  %1781 = vperm.xlu0 %2818, %v1751_v8  }
 0x220   : > { %1786 = vperm.xlu1 %2819, %v1752_v15   ;;  %1791 = vperm.xlu0 %2818, %v1753_v20  }
 0x224   : > { %1796 = vperm.xlu1 %2819, %v1754_v17   ;;  %1801 = vperm.xlu0 %2818, %v1755_v18  }
 0x228   : > { %1806 = vperm.xlu1 %2819, %v1756_v22   ;;  %1811 = vperm.xlu0 %2818, %v1757_v23  }
 0x22c   : > { %1816 = vperm.xlu1 %2819, %v1758_v24   ;;  %1821 = vperm.xlu0 %2818, %v1759_v26  }
 0x230   : > { %1826 = vperm.xlu1 %2819, %v1760_v12   ;;  %1831 = vperm.xlu0 %2818, %v1761_v27  }
 0x234   : > { %1836 = vperm.xlu1 %2819, %v1762_v28   ;;  %1841 = vperm.xlu0 %2818, %v1763_v13  }
 0x23a   : > { %v1185_v29 = vpop.permute.xlu1 %1184 }
 0x23e   : > { %v1187_v31 = vpop.permute.xlu1 %1186 }
 0x23f   : > { %v1205_v41 = vsel %vm1204_vm6, %v1185_v29, %v1187_v31 }
 0x25a   : > { %v1189_v35 = vpop.permute.xlu0 %1188 }
 0x25b   : > { %v1206_v38 = vsel %vm1204_vm6, %v1187_v31, %v1189_v35 }
 0x25c   : > { %1228 = vmatprep.subr.bf16.mxu1 %v1206_v38 }
 0x25d   : > { %1229 = vmatpush1.bf16.msra.mxu1 %v1205_v41 }
 0x25e   : > { %v1197_v42 = vpop.permute.xlu0 %1196 }
 0x262   : > { %v1199_v44 = vpop.permute.xlu1 %1198  ;;  %v1195_v50 = vpop.permute.xlu0 %1194 }
 0x263   : > { %v1209_v36 = vsel %vm1204_vm6, %v1195_v50, %v1197_v42  ;;  %v1210_v45 = vsel %vm1204_vm6, %v1197_v42, %v1199_v44 }
 0x264   : > { %1230 = vmatprep.subr.bf16.mxu1 %v1210_v45 }
 0x265   : > { %1231 = vmatpush1.bf16.msra.mxu1 %v1209_v36 }
 0x266   : > { %v1191_v59 = vpop.permute.xlu1 %1190  ;;  %v1193_v54 = vpop.permute.xlu0 %1192 }
 0x267   : > { %v1207_v60 = vsel %vm1204_vm6, %v1189_v35, %v1191_v59  ;;  %v1208_v48 = vsel %vm1204_vm6, %v1191_v59, %v1193_v54 }
 0x268   : > { %2604 = vmatmul.mubr.msk.bf16.vlgmr.msra.gmra.mrb[16].mxu1 %vm1221_vm8, %v2822_v57  ;;  %1281 = vmatprep.subr.bf16.mxu1 %v1208_v48 }
 0x269   : > { %1282 = vmatpush1.bf16.msra.mxu1 %v1207_v60  ;;  %1270 = vmatprep.mubr.bf16.mxu1 %v2997_v52 }
 0x26a   : > { %v1201_v1 = vpop.permute.xlu1 %1200  ;;  %v1203_v53 = vpop.permute.xlu0 %1202 }
 0x26b   : > { %v1211_v46 = vsel %vm1204_vm6, %v1199_v44, %v1201_v1  ;;  %v1212_v10 = vsel %vm1204_vm6, %v1201_v1, %v1203_v53 }
 0x26c   : > { %1283 = vmatprep.subr.bf16.mxu1 %v1212_v10 }
 0x26d   : > { %1284 = vmatpush1.bf16.msra.mxu1 %v1211_v46 }
 0x26e   : > { %2612 = vmatprep.subr.msk.bf16.mxu1 %vm2610_vm10, %v2611_v47  ;;  %v1474_v32 = vpop.permute.xlu1 %1473  ;;  %v1476_v33 = vpop.permute.xlu0 %1475 }
 0x26f   : > { %v1493_v37 = vsel %vm1491_vm12, %v1474_v32, %v1476_v33 }
 0x270   : > { %2605 = vmatmul.mubr.msk.bf16.gmra.mrb[20].mxu1 %vm1221_vm8, %v2823_v11 }
 0x271   : > { %1313 = vmatprep.mubr.bf16.mxu1 %v2997_v52 }
 0x272   : > { %v1484_v40 = vpop.permute.xlu0 %1483 }
 0x276   : > { %v1482_v61 = vpop.permute.xlu0 %1481 }
 0x278   : > { %2606 = vmatmul.mubr.msk.bf16.vlgmr.msra.gmra.mrb[24].mxu1 %vm1221_vm8, %v2822_v57 }
 0x279   : > { %2615 = vmatpush1.bf16.msk.msra.mxu1 %vm2613_vm11, %v2614_v39  ;;  %1323 = vmatprep.mubr.bf16.mxu1 %v2997_v52  ;;  %v1472_v39 = vpop.permute.xlu1 %1471 }
 0x27a   : > { %2618 = vmatprep.subr.msk.bf16.mxu1 %vm2610_vm10, %v2617_v9  ;;  %v1492_v0 = vsel %vm1491_vm12, %v1472_v39, %v1474_v32  ;;  %v1496_v9 = vsel %vm1491_vm12, %v1482_v61, %v1484_v40 }
 0x27d   : > { %2621 = vmatpush1.bf16.msk.msra.mxu1 %vm2613_vm11, %v2620_v6  ;;  %v1486_v47 = vpop.permute.xlu1 %1485  ;;  %v1480_v6 = vpop.permute.xlu0 %1479 }
 0x27e   : > { %2626 = vmatprep.subr.msk.bf16.mxu1 %vm2624_vm9, %v2625_v25  ;;  %v1497_v62 = vsel %vm1491_vm12, %v1484_v40, %v1486_v47  ;;  %v2827_v25 = vld [vmem:[%s4234_s4 + $0x28] sm:$0xff]  }
 0x280   : > { %2607 = vmatmul.mubr.msk.bf16.gmra.mrb[28].mxu1 %vm1221_vm8, %v2823_v11 }
 0x281   : > { %1382 = vmatprep.mubr.bf16.mxu1 %v2997_v52  ;;  %v1478_v3 = vpop.permute.xlu1 %1477  ;;  %v1490_v14 = vpop.permute.xlu0 %1489 }
 0x282   : > { %v1495_v63 = vsel %vm1491_vm12, %v1478_v3, %v1480_v6  ;;  %v1494_v16 = vsel %vm1491_vm12, %v1476_v33, %v1478_v3 }
 0x285   : > { %v1488_v7 = vpop.permute.xlu1 %1487 }
 0x286   : > { %v1498_v21 = vsel %vm1491_vm12, %v1486_v47, %v1488_v7  ;;  %v3883_v47 = vld [vmem:[%s4236_s6] sm:$0xff]  }
 0x288   : > { %2622 = vmatmul.mubr.msk.bf16.vlgmr.msra.gmra.mrb[16].mxu1 %vm1221_vm8, %v2824_v30 }
 0x289   : > { %2629 = vmatpush1.bf16.msk.msra.mxu1 %vm2627_vm7, %v2628_v19  ;;  %1392 = vmatprep.mubr.bf16.mxu1 %v2997_v52  ;;  %v1499_v19 = vsel %vm1491_vm12, %v1488_v7, %v1490_v14 }
 0x28a   : > { %2632 = vmatprep.subr.msk.bf16.mxu1 %vm2624_vm9, %v2631_v58 }
 0x28d   : > { %2635 = vmatpush1.bf16.msk.msra.mxu1 %vm2627_vm7, %v2634_v43 }
 0x28e   : > { %1514 = vmatprep.subr.bf16.mxu1 %v1493_v37 }
 0x28f   : > { %v1643_v49 = vpop.permute.xlu1 %1642  ;;  %v1648_v56 = vpop.permute.xlu0 %1647 }
 0x290   : > { %2623 = vmatmul.mubr.msk.bf16.gmra.mrb[20].mxu1 %vm1221_vm8, %v2825_v34 }
 0x291   : > { %1435 = vmatprep.mubr.bf16.mxu1 %v2997_v52 }
 0x293   : > { %v1653_v26 = vpop.permute.xlu1 %1652  ;;  %v1658_v38 = vpop.permute.xlu0 %1657 }
 0x298   : > { %2636 = vmatmul.mubr.msk.bf16.vlgmr.msra.gmra.mrb[24].mxu1 %vm1221_vm8, %v2824_v30 }
 0x299   : > { %1515 = vmatpush1.bf16.msra.mxu1 %v1492_v0  ;;  %1445 = vmatprep.mubr.bf16.mxu1 %v2997_v52 }
 0x29a   : > { %1516 = vmatprep.subr.bf16.mxu1 %v1497_v62 }
 0x29d   : > { %1517 = vmatpush1.bf16.msra.mxu1 %v1496_v9 }
 0x29e   : > { %1567 = vmatprep.subr.bf16.mxu1 %v1495_v63 }
 0x2a0   : > { %2637 = vmatmul.mubr.msk.bf16.gmra.mrb[28].mxu1 %vm1221_vm8, %v2825_v34 }
 0x2a1   : > { %1546 = vmatprep.mubr.bf16.mxu1 %v2997_v52 }
 0x2a8   : > { %2644 = vmatmul.mubr.msk.bf16.vlgmr.msra.gmra.mrb[16].mxu1 %vm1221_vm8, %v2826_v2 }
 0x2a9   : > { %1568 = vmatpush1.bf16.msra.mxu1 %v1494_v16  ;;  %1556 = vmatprep.mubr.bf16.mxu1 %v2997_v52 }
 0x2aa   : > { %1569 = vmatprep.subr.bf16.mxu1 %v1499_v19 }
 0x2ad   : > { %1570 = vmatpush1.bf16.msra.mxu1 %v1498_v21 }
 0x2b0   : > { %2645 = vmatmul.mubr.msk.bf16.gmra.mrb[20].mxu1 %vm1221_vm8, %v2827_v25 }
 0x2b1   : > { %1599 = vmatprep.mubr.bf16.mxu1 %v2997_v52 }
 0x2b8   : > { %2646 = vmatmul.mubr.msk.bf16.vlgmr.msra.gmra.mrb[24].mxu1 %vm1221_vm8, %v2826_v2 }
 0x2b9   : > { %1609 = vmatprep.mubr.bf16.mxu1 %v2997_v52 }
 0x2c0   : > { %2647 = vmatmul.mubr.msk.bf16.gmra.mrb[28].mxu1 %vm1221_vm8, %v2827_v25 }
 0x37b   : > { %v1548_v51 = vpop.f32.mrb[16].mxu1 }
 0x37c   : > { %v1660_v55 = vadd.f32 %v1643_v49, %v1548_v51  ;;  %v1550_v43 = vpop.f32.mrb[17].mxu1 }
 0x37d   : > { %v1661_v58 = vadd.f32 %v1643_v49, %v1550_v43  ;;  %v1552_v4 = vpop.f32.mrb[18].mxu1 }
 0x37e   : > { %v1692_v5 = vmul.f32 0.01, %v1660_v55  ;;  %v1664_v8 = vadd.f32 %v1648_v56, %v1552_v4  ;;  %v1554_v15 = vpop.f32.mrb[19].mxu1  ;;  %vm1676_vm13 = vcmp.gt.f32.partialorder %v1660_v55, 0.0 }
 0x37f   : > { %v1693_v20 = vmul.f32 0.01, %v1661_v58  ;;  %v1665_v17 = vadd.f32 %v1648_v56, %v1554_v15  ;;  %vm1677_vm14 = vcmp.gt.f32.partialorder %v1661_v58, 0.0 }
 0x380   : > { %vm1680_vm15 = vcmp.gt.f32.partialorder %v1664_v8, 0.0  ;;  %v1696_v18 = vmul.f32 0.01, %v1664_v8  ;;  %v1708_v23 = vsel %vm1676_vm13, %v1660_v55, %v1692_v5 }
 0x381   : > { %vm1681_vm0 = vcmp.gt.f32.partialorder %v1665_v17, 0.0  ;;  %v1697_v22 = vmul.f32 0.01, %v1665_v17  ;;  %v1709_v28 = vsel %vm1677_vm14, %v1661_v58, %v1693_v20 }
 0x382   : > { %v1712_v24 = vsel %vm1680_vm15, %v1664_v8, %v1696_v18 }
 0x383   : > { %v1724_v12 = vpack.c.bf16 %v1712_v24, %v1708_v23  ;;  %v1558_v27 = vpop.f32.mrb[20].mxu1  ;;  %v1713_v13 = vsel %vm1681_vm0, %v1665_v17, %v1697_v22  ;;  %v2830_v24 = vld [vmem:[%s4236_s6 + $0x10] sm:$0xff]  }
 0x384   : > { %v1668_v29 = vadd.f32 %v1653_v26, %v1558_v27  ;;  %v1560_v31 = vpop.f32.mrb[21].mxu1  ;;  %v1725_v35 = vpack.c.bf16 %v1713_v13, %v1709_v28  ;;  %v2833_v27 = vld [vmem:[%s4236_s6 + $0x28] sm:$0xff]   ;;  %v2834_v28 = vld [vmem:[%s4236_s6 + $0x30] sm:$0xff]   ;;  %v2835_v13 = vld [vmem:[%s4236_s6 + $0x38] sm:$0xff]  }
 0x385   : > { %v1669_v41 = vadd.f32 %v1653_v26, %v1560_v31  ;;  %v1562_v42 = vpop.f32.mrb[22].mxu1 }
 0x386   : > { %v1700_v44 = vmul.f32 0.01, %v1668_v29  ;;  %v1672_v50 = vadd.f32 %v1658_v38, %v1562_v42  ;;  %v1564_v36 = vpop.f32.mrb[23].mxu1  ;;  %1908 = vmatprep.subr.bf16.mxu0 %v1725_v35  ;;  %vm1684_vm1 = vcmp.gt.f32.partialorder %v1668_v29, 0.0 }
 0x387   : > { %v1701_v45 = vmul.f32 0.01, %v1669_v41  ;;  %v1673_v57 = vadd.f32 %v1658_v38, %v1564_v36  ;;  %1909 = vmatpush1.bf16.msra.mxu0 %v1724_v12  ;;  %vm1685_vm2 = vcmp.gt.f32.partialorder %v1669_v41, 0.0  ;;  %v2832_v12 = vld [vmem:[%s4236_s6 + $0x20] sm:$0xff]  }
 0x388   : > { %vm1688_vm3 = vcmp.gt.f32.partialorder %v1672_v50, 0.0  ;;  %v1704_v59 = vmul.f32 0.01, %v1672_v50  ;;  %v1716_v60 = vsel %vm1684_vm1, %v1668_v29, %v1700_v44  ;;  %v3939_v29 = vpop.permute.xlu1 %1766 }
 0x389   : > { %vm1689_vm4 = vcmp.gt.f32.partialorder %v1673_v57, 0.0  ;;  %v1705_v54 = vmul.f32 0.01, %v1673_v57  ;;  %v1717_v46 = vsel %vm1685_vm2, %v1669_v41, %v1701_v45  ;;  %v3942_v41 = vpop.permute.xlu0 %1771 }
 0x38a   : > { %v1720_v48 = vsel %vm1688_vm3, %v1672_v50, %v1704_v59  ;;  %v2836_v50 = vld [vmem:[%s3272_s23] sm:$0xff] }
 0x38b   : > { %v1728_v1 = vpack.c.bf16 %v1720_v48, %v1716_v60  ;;  %v1601_v53 = vpop.f32.mrb[24].mxu1  ;;  %v1721_v10 = vsel %vm1689_vm4, %v1673_v57, %v1705_v54  ;;  %v2837_v57 = vld [vmem:[%s3272_s23 + $0x8] sm:$0xff]  ;;  %v2838_v48 = vld [vmem:[%s3272_s23 + $0x20] sm:$0xff] }
 0x38c   : > { %v1662_v11 = vadd.f32 %v1643_v49, %v1601_v53  ;;  %v1603_v30 = vpop.f32.mrb[25].mxu1  ;;  %v1729_v32 = vpack.c.bf16 %v1721_v10, %v1717_v46  ;;  %v2839_v46 = vld [vmem:[%s3272_s23 + $0x28] sm:$0xff] }
 0x38d   : > { %v1663_v33 = vadd.f32 %v1643_v49, %v1603_v30  ;;  %v1605_v34 = vpop.f32.mrb[26].mxu1 }
 0x38e   : > { %v1694_v37 = vmul.f32 0.01, %v1662_v11  ;;  %v1666_v39 = vadd.f32 %v1648_v56, %v1605_v34  ;;  %v1607_v40 = vpop.f32.mrb[27].mxu1  ;;  %1910 = vmatprep.subr.bf16.mxu0 %v1729_v32  ;;  %vm1678_vm5 = vcmp.gt.f32.partialorder %v1662_v11, 0.0  ;;  %v3951_v32 = vpop.permute.xlu1 %1776 }
 0x38f   : > { %v1695_v61 = vmul.f32 0.01, %v1663_v33  ;;  %v1667_v0 = vadd.f32 %v1648_v56, %v1607_v40  ;;  %1911 = vmatpush1.bf16.msra.mxu0 %v1728_v1  ;;  %vm1679_vm6 = vcmp.gt.f32.partialorder %v1663_v33, 0.0  ;;  %v2829_v56 = vld [vmem:[%s4236_s6 + $0x8] sm:$0xff]  }
 0x390   : > { %vm1682_vm10 = vcmp.gt.f32.partialorder %v1666_v39, 0.0  ;;  %v1698_v62 = vmul.f32 0.01, %v1666_v39  ;;  %v1710_v6 = vsel %vm1678_vm5, %v1662_v11, %v1694_v37 }
 0x391   : > { %vm1683_vm11 = vcmp.gt.f32.partialorder %v1667_v0, 0.0  ;;  %v1699_v3 = vmul.f32 0.01, %v1667_v0  ;;  %v1711_v7 = vsel %vm1679_vm6, %v1663_v33, %v1695_v61  ;;  %v3959_v61 = vpop.permute.xlu0 %1781 }
 0x392   : > { %v1714_v9 = vsel %vm1682_vm10, %v1666_v39, %v1698_v62  ;;  %2656 = vmatmul.mubr.msk.bf16.vlgmr.msra.gmra.mrb[4].mxu0 %vm1221_vm8, %v3883_v47 }
 0x393   : > { %v1726_v63 = vpack.c.bf16 %v1714_v9, %v1710_v6  ;;  %v1611_v2 = vpop.f32.mrb[28].mxu1  ;;  %v1715_v14 = vsel %vm1683_vm11, %v1667_v0, %v1699_v3  ;;  %1950 = vmatprep.mubr.bf16.mxu0 %v2997_v52  ;;  %v2840_v6 = vld [vmem:[%s3272_s23 + $0x40] sm:$0xff] }
 0x394   : > { %v1670_v16 = vadd.f32 %v1653_v26, %v1611_v2  ;;  %v1613_v19 = vpop.f32.mrb[29].mxu1  ;;  %v1727_v21 = vpack.c.bf16 %v1715_v14, %v1711_v7  ;;  %v2841_v7 = vld [vmem:[%s3272_s23 + $0x48] sm:$0xff] }
 0x395   : > { %v1671_v25 = vadd.f32 %v1653_v26, %v1613_v19  ;;  %v1615_v49 = vpop.f32.mrb[30].mxu1  ;;  %v2831_v26 = vld [vmem:[%s4236_s6 + $0x18] sm:$0xff]  }
 0x396   : > { %v1702_v51 = vmul.f32 0.01, %v1670_v16  ;;  %v1674_v55 = vadd.f32 %v1658_v38, %v1615_v49  ;;  %v1617_v43 = vpop.f32.mrb[31].mxu1  ;;  %2021 = vmatprep.subr.bf16.mxu0 %v1727_v21  ;;  %vm1686_vm9 = vcmp.gt.f32.partialorder %v1670_v16, 0.0  ;;  %v2842_v21 = vld [vmem:[%s3272_s23 + $0x60] sm:$0xff] }
 0x397   : > { %v1703_v58 = vmul.f32 0.01, %v1671_v25  ;;  %v1675_v4 = vadd.f32 %v1658_v38, %v1617_v43  ;;  %2022 = vmatpush1.bf16.msra.mxu0 %v1726_v63  ;;  %vm1687_vm7 = vcmp.gt.f32.partialorder %v1671_v25, 0.0 }
 0x398   : > { %vm1690_vm12 = vcmp.gt.f32.partialorder %v1674_v55, 0.0  ;;  %v1706_v5 = vmul.f32 0.01, %v1674_v55  ;;  %v1718_v15 = vsel %vm1686_vm9, %v1670_v16, %v1702_v51  ;;  %v2843_v51 = vld [vmem:[%s3272_s23 + $0x68] sm:$0xff] }
 0x399   : > { %vm1691_vm13 = vcmp.gt.f32.partialorder %v1675_v4, 0.0  ;;  %v1707_v8 = vmul.f32 0.01, %v1675_v4  ;;  %v1719_v18 = vsel %vm1687_vm7, %v1671_v25, %v1703_v58  ;;  %v3970_v58 = vpop.permute.xlu1 %1786 }
 0x39a   : > { %v1722_v20 = vsel %vm1690_vm12, %v1674_v55, %v1706_v5  ;;  %2657 = vmatmul.mubr.msk.bf16.gmra.mrb[8].mxu0 %vm1221_vm8, %v2829_v56 }
 0x39b   : > { %v1730_v17 = vpack.c.bf16 %v1722_v20, %v1718_v15  ;;  %v1723_v22 = vsel %vm1691_vm13, %v1675_v4, %v1707_v8  ;;  %1960 = vmatprep.mubr.bf16.mxu0 %v2997_v52 }
 0x39c   : > { %v1731_v23 = vpack.c.bf16 %v1723_v22, %v1719_v18  ;;  %v3975_v18 = vpop.permute.xlu0 %1791 }
 0x39e   : > { %2023 = vmatprep.subr.bf16.mxu0 %v1731_v23 }
 0x39f   : > { %2024 = vmatpush1.bf16.msra.mxu0 %v1730_v17 }
 0x3a2   : > { %2658 = vmatmul.mubr.msk.bf16.gmra.mrb[12].mxu0 %vm1221_vm8, %v2830_v24 }
 0x3a3   : > { %1970 = vmatprep.mubr.bf16.mxu0 %v2997_v52 }
 0x3aa   : > { %2659 = vmatmul.mubr.msk.bf16.gmra.mrb[16].mxu0 %vm1221_vm8, %v2831_v26 }
 0x3ab   : > { %1980 = vmatprep.mubr.bf16.mxu0 %v2997_v52 }
 0x3b2   : > { %2660 = vmatmul.mubr.msk.bf16.gmra.mrb[20].mxu0 %vm1221_vm8, %v2832_v12 }
 0x3b3   : > { %1990 = vmatprep.mubr.bf16.mxu0 %v2997_v52 }
 0x3ba   : > { %2661 = vmatmul.mubr.msk.bf16.gmra.mrb[24].mxu0 %vm1221_vm8, %v2833_v27 }
 0x3bb   : > { %2000 = vmatprep.mubr.bf16.mxu0 %v2997_v52 }
 0x3c2   : > { %2662 = vmatmul.mubr.msk.bf16.gmra.mrb[28].mxu0 %vm1221_vm8, %v2834_v28 }
 0x3c3   : > { %2010 = vmatprep.mubr.bf16.mxu0 %v2997_v52 }
 0x3ca   : > { %2663 = vmatmul.mubr.msk.bf16.gmra.mrb[32].mxu0 %vm1221_vm8, %v2835_v13 }
 0x3cb   : > { %2053 = vmatprep.mubr.bf16.mxu0 %v2997_v52 }
 0x3d2   : > { %2664 = vmatmul.mubr.msk.bf16.vlgmr.msra.gmra.mrb[36].mxu0 %vm1221_vm8, %v3883_v47 }
 0x3d3   : > { %2063 = vmatprep.mubr.bf16.mxu0 %v2997_v52 }
 0x3da   : > { %2665 = vmatmul.mubr.msk.bf16.gmra.mrb[40].mxu0 %vm1221_vm8, %v2829_v56 }
 0x3db   : > { %2073 = vmatprep.mubr.bf16.mxu0 %v2997_v52 }
 0x3e2   : > { %2666 = vmatmul.mubr.msk.bf16.gmra.mrb[44].mxu0 %vm1221_vm8, %v2830_v24 }
 0x3e3   : > { %2083 = vmatprep.mubr.bf16.mxu0 %v2997_v52 }
 0x3ea   : > { %2667 = vmatmul.mubr.msk.bf16.gmra.mrb[48].mxu0 %vm1221_vm8, %v2831_v26  ;;  %v2844_v26 = vld [vmem:[%s3272_s23 + $0x80] sm:$0xff] }
 0x3eb   : > { %2093 = vmatprep.mubr.bf16.mxu0 %v2997_v52 }
 0x3f2   : > { %2668 = vmatmul.mubr.msk.bf16.gmra.mrb[52].mxu0 %vm1221_vm8, %v2832_v12 }
 0x3f3   : > { %2103 = vmatprep.mubr.bf16.mxu0 %v2997_v52 }
 0x3fa   : > { %2669 = vmatmul.mubr.msk.bf16.gmra.mrb[56].mxu0 %vm1221_vm8, %v2833_v27 }
 0x3fb   : > { %2113 = vmatprep.mubr.bf16.mxu0 %v2997_v52 }
 0x402   : > { %2670 = vmatmul.mubr.msk.bf16.gmra.mrb[60].mxu0 %vm1221_vm8, %v2834_v28 }
 0x403   : > { %2123 = vmatprep.mubr.bf16.mxu0 %v2997_v52 }
 0x40a   : > { %2671 = vmatmul.mubr.msk.bf16.gmra.mrb[64].mxu0 %vm1221_vm8, %v2835_v13  ;;  %v2845_v13 = vld [vmem:[%s3272_s23 + $0x88] sm:$0xff] }
 0x465   : > { %v1942_v31 = vpop.f32.mrb[4].mxu0 }
 0x466   : > { %v1943_v35 = vadd.f32 %v1942_v31, %v3939_v29  ;;  %v1944_v38 = vpop.f32.mrb[5].mxu0 }
 0x467   : > { %v1945_v42 = vadd.f32 %v1944_v38, %v3939_v29  ;;  %v1946_v44 = vpop.f32.mrb[6].mxu0 }
 0x468   : > { %v2134_v36 = vadd.f32 %v2836_v50, %v1943_v35  ;;  %v1947_v45 = vadd.f32 %v1946_v44, %v3942_v41  ;;  %v1948_v52 = vpop.f32.mrb[7].mxu0 }
 0x469   : > { %v2135_v59 = vadd.f32 %v2837_v57, %v1945_v42  ;;  %v1949_v54 = vadd.f32 %v1948_v52, %v3942_v41  ;;  %v2846_v42 = vld [vmem:[%s3272_s23 + $0xa0] sm:$0xff] }
 0x46a   : > { %vm2198_vm8 = vcmp.gt.f32.partialorder %v2134_v36, 0.0  ;;  %v2262_v60 = vmul.f32 0.01, %v2134_v36  ;;  %v2138_v1 = vadd.f32 %v2838_v48, %v1947_v45 }
 0x46b   : > { %vm2199_vm14 = vcmp.gt.f32.partialorder %v2135_v59, 0.0  ;;  %v2263_v53 = vmul.f32 0.01, %v2135_v59  ;;  %v2139_v10 = vadd.f32 %v2839_v46, %v1949_v54 }
 0x46c   : > { %v2326_v11 = vsel %vm2198_vm8, %v2134_v36, %v2262_v60  ;;  %vm2202_vm15 = vcmp.gt.f32.partialorder %v2138_v1, 0.0  ;;  %v2266_v30 = vmul.f32 0.01, %v2138_v1  ;;  %v2847_v36 = vld [vmem:[%s3272_s23 + $0xa8] sm:$0xff] }
 0x46d   : > { %2390 = vst [vmem:[%s3954_s25] sm:$0xff] %v2326_v11  ;;  %v2327_v33 = vsel %vm2199_vm14, %v2135_v59, %v2263_v53  ;;  %vm2203_vm0 = vcmp.gt.f32.partialorder %v2139_v10, 0.0  ;;  %v2267_v34 = vmul.f32 0.01, %v2139_v10  ;;  %v1952_v37 = vpop.f32.mrb[8].mxu0  ;;  %v3986_v59 = vpop.permute.xlu1 %1796 }
 0x46e   : > { %2391 = vst [vmem:[%s3954_s25 + $0x8] sm:$0xff] %v2327_v33  ;;  %v2330_v39 = vsel %vm2202_vm15, %v2138_v1, %v2266_v30  ;;  %v1953_v40 = vadd.f32 %v1952_v37, %v3951_v32  ;;  %v1954_v47 = vpop.f32.mrb[9].mxu0 }
 0x46f   : > { %2394 = vst [vmem:[%s3954_s25 + $0x20] sm:$0xff] %v2330_v39  ;;  %v2331_v0 = vsel %vm2203_vm0, %v2139_v10, %v2267_v34  ;;  %v1955_v62 = vadd.f32 %v1954_v47, %v3951_v32  ;;  %v1956_v3 = vpop.f32.mrb[10].mxu0  ;;  %v3991_v10 = vpop.permute.xlu0 %1801  ;;  %v2848_v34 = vld [vmem:[%s3272_s23 + $0xc0] sm:$0xff]  ;;  %v2849_v47 = vld [vmem:[%s3272_s23 + $0xc8] sm:$0xff] }
 0x470   : > { %2395 = vst [vmem:[%s3954_s25 + $0x28] sm:$0xff] %v2331_v0  ;;  %v2142_v9 = vadd.f32 %v2840_v6, %v1953_v40  ;;  %v1957_v63 = vadd.f32 %v1956_v3, %v3959_v61  ;;  %v1958_v2 = vpop.f32.mrb[11].mxu0  ;;  %v2850_v6 = vld [vmem:[%s3272_s23 + $0xe0] sm:$0xff] }
 0x471   : > { %v2143_v14 = vadd.f32 %v2841_v7, %v1955_v62  ;;  %v1959_v16 = vadd.f32 %v1958_v2, %v3959_v61  ;;  %v2851_v2 = vld [vmem:[%s3272_s23 + $0xe8] sm:$0xff] }
 0x472   : > { %vm2206_vm1 = vcmp.gt.f32.partialorder %v2142_v9, 0.0  ;;  %v2270_v19 = vmul.f32 0.01, %v2142_v9  ;;  %v2146_v25 = vadd.f32 %v2842_v21, %v1957_v63 }
 0x473   : > { %vm2207_vm2 = vcmp.gt.f32.partialorder %v2143_v14, 0.0  ;;  %v2271_v49 = vmul.f32 0.01, %v2143_v14  ;;  %v2147_v55 = vadd.f32 %v2843_v51, %v1959_v16 }
 0x474   : > { %v2334_v43 = vsel %vm2206_vm1, %v2142_v9, %v2270_v19  ;;  %vm2210_vm3 = vcmp.gt.f32.partialorder %v2146_v25, 0.0  ;;  %v2274_v56 = vmul.f32 0.01, %v2146_v25  ;;  %v4002_v19 = vpop.permute.xlu1 %1806 }
 0x475   : > { %2398 = vst [vmem:[%s3954_s25 + $0x40] sm:$0xff] %v2334_v43  ;;  %v2335_v4 = vsel %vm2207_vm2, %v2143_v14, %v2271_v49  ;;  %vm2211_vm4 = vcmp.gt.f32.partialorder %v2147_v55, 0.0  ;;  %v2275_v5 = vmul.f32 0.01, %v2147_v55  ;;  %v1962_v8 = vpop.f32.mrb[12].mxu0 }
 0x476   : > { %2399 = vst [vmem:[%s3954_s25 + $0x48] sm:$0xff] %v2335_v4  ;;  %v2338_v15 = vsel %vm2210_vm3, %v2146_v25, %v2274_v56  ;;  %v1963_v20 = vadd.f32 %v1962_v8, %v3970_v58  ;;  %v1964_v17 = vpop.f32.mrb[13].mxu0  ;;  %v4007_v56 = vpop.permute.xlu0 %1811 }
 0x477   : > { %2402 = vst [vmem:[%s3954_s25 + $0x60] sm:$0xff] %v2338_v15  ;;  %v2339_v22 = vsel %vm2211_vm4, %v2147_v55, %v2275_v5  ;;  %v1965_v23 = vadd.f32 %v1964_v17, %v3970_v58  ;;  %v1966_v24 = vpop.f32.mrb[14].mxu0  ;;  %v2852_v15 = vld [vmem:[%s3272_s23 + $0x100] sm:$0xff] }
 0x478   : > { %2403 = vst [vmem:[%s3954_s25 + $0x68] sm:$0xff] %v2339_v22  ;;  %v2150_v12 = vadd.f32 %v2844_v26, %v1963_v20  ;;  %v1967_v27 = vadd.f32 %v1966_v24, %v3975_v18  ;;  %v1968_v28 = vpop.f32.mrb[15].mxu0 }
 0x479   : > { %v2151_v31 = vadd.f32 %v2845_v13, %v1965_v23  ;;  %v1969_v35 = vadd.f32 %v1968_v28, %v3975_v18  ;;  %v2853_v23 = vld [vmem:[%s3272_s23 + $0x108] sm:$0xff] }
 0x47a   : > { %vm2214_vm5 = vcmp.gt.f32.partialorder %v2150_v12, 0.0  ;;  %v2278_v38 = vmul.f32 0.01, %v2150_v12  ;;  %v2154_v44 = vadd.f32 %v2846_v42, %v1967_v27  ;;  %v2854_v27 = vld [vmem:[%s3272_s23 + $0x120] sm:$0xff] }
 0x47b   : > { %vm2215_vm6 = vcmp.gt.f32.partialorder %v2151_v31, 0.0  ;;  %v2279_v50 = vmul.f32 0.01, %v2151_v31  ;;  %v2155_v45 = vadd.f32 %v2847_v36, %v1969_v35 }
 0x47c   : > { %v2342_v52 = vsel %vm2214_vm5, %v2150_v12, %v2278_v38  ;;  %vm2218_vm10 = vcmp.gt.f32.partialorder %v2154_v44, 0.0  ;;  %v2282_v57 = vmul.f32 0.01, %v2154_v44 }
 0x47d   : > { %2406 = vst [vmem:[%s3954_s25 + $0x80] sm:$0xff] %v2342_v52  ;;  %v2343_v54 = vsel %vm2215_vm6, %v2151_v31, %v2279_v50  ;;  %vm2219_vm11 = vcmp.gt.f32.partialorder %v2155_v45, 0.0  ;;  %v2283_v60 = vmul.f32 0.01, %v2155_v45  ;;  %v1972_v48 = vpop.f32.mrb[16].mxu0  ;;  %v2855_v31 = vld [vmem:[%s3272_s23 + $0x128] sm:$0xff] }
 0x47e   : > { %2407 = vst [vmem:[%s3954_s25 + $0x88] sm:$0xff] %v2343_v54  ;;  %v2346_v1 = vsel %vm2218_vm10, %v2154_v44, %v2282_v57  ;;  %v1973_v53 = vadd.f32 %v1972_v48, %v3986_v59  ;;  %v1974_v46 = vpop.f32.mrb[17].mxu0  ;;  %v4018_v44 = vpop.permute.xlu1 %1816 }
 0x47f   : > { %2410 = vst [vmem:[%s3954_s25 + $0xa0] sm:$0xff] %v2346_v1  ;;  %v2347_v11 = vsel %vm2219_vm11, %v2155_v45, %v2283_v60  ;;  %v1975_v30 = vadd.f32 %v1974_v46, %v3986_v59  ;;  %v1976_v33 = vpop.f32.mrb[18].mxu0  ;;  %v4023_v60 = vpop.permute.xlu0 %1821  ;;  %v2856_v46 = vld [vmem:[%s3272_s23 + $0x140] sm:$0xff] }
 0x480   : > { %2411 = vst [vmem:[%s3954_s25 + $0xa8] sm:$0xff] %v2347_v11  ;;  %v2158_v37 = vadd.f32 %v2848_v34, %v1973_v53  ;;  %v1977_v39 = vadd.f32 %v1976_v33, %v3991_v10  ;;  %v1978_v40 = vpop.f32.mrb[19].mxu0  ;;  %v2857_v34 = vld [vmem:[%s3272_s23 + $0x148] sm:$0xff] }
 0x481   : > { %v2159_v0 = vadd.f32 %v2849_v47, %v1975_v30  ;;  %v1979_v62 = vadd.f32 %v1978_v40, %v3991_v10  ;;  %v2858_v47 = vld [vmem:[%s3272_s23 + $0x160] sm:$0xff] }
 0x482   : > { %vm2222_vm9 = vcmp.gt.f32.partialorder %v2158_v37, 0.0  ;;  %v2286_v3 = vmul.f32 0.01, %v2158_v37  ;;  %v2162_v9 = vadd.f32 %v2850_v6, %v1977_v39 }
 0x483   : > { %vm2223_vm7 = vcmp.gt.f32.partialorder %v2159_v0, 0.0  ;;  %v2287_v63 = vmul.f32 0.01, %v2159_v0  ;;  %v2163_v7 = vadd.f32 %v2851_v2, %v1979_v62  ;;  %v4034_v2 = vpop.permute.xlu1 %1826 }
 0x484   : > { %v2350_v14 = vsel %vm2222_vm9, %v2158_v37, %v2286_v3  ;;  %vm2226_vm12 = vcmp.gt.f32.partialorder %v2162_v9, 0.0  ;;  %v2290_v16 = vmul.f32 0.01, %v2162_v9  ;;  %v2859_v3 = vld [vmem:[%s3272_s23 + $0x168] sm:$0xff] }
 0x485   : > { %2414 = vst [vmem:[%s3954_s25 + $0xc0] sm:$0xff] %v2350_v14  ;;  %v2351_v21 = vsel %vm2223_vm7, %v2159_v0, %v2287_v63  ;;  %vm2227_vm13 = vcmp.gt.f32.partialorder %v2163_v7, 0.0  ;;  %v2291_v25 = vmul.f32 0.01, %v2163_v7  ;;  %v1982_v49 = vpop.f32.mrb[20].mxu0 }
 0x486   : > { %2415 = vst [vmem:[%s3954_s25 + $0xc8] sm:$0xff] %v2351_v21  ;;  %v2354_v51 = vsel %vm2226_vm12, %v2162_v9, %v2290_v16  ;;  %v1983_v55 = vadd.f32 %v1982_v49, %v4002_v19  ;;  %v1984_v43 = vpop.f32.mrb[21].mxu0 }
 0x487   : > { %2418 = vst [vmem:[%s3954_s25 + $0xe0] sm:$0xff] %v2354_v51  ;;  %v2355_v4 = vsel %vm2227_vm13, %v2163_v7, %v2291_v25  ;;  %v1985_v5 = vadd.f32 %v1984_v43, %v4002_v19  ;;  %v1986_v8 = vpop.f32.mrb[22].mxu0  ;;  %v4039_v51 = vpop.permute.xlu0 %1831 }
 0x488   : > { %2419 = vst [vmem:[%s3954_s25 + $0xe8] sm:$0xff] %v2355_v4  ;;  %v2166_v20 = vadd.f32 %v2852_v15, %v1983_v55  ;;  %v1987_v17 = vadd.f32 %v1986_v8, %v4007_v56  ;;  %v1988_v22 = vpop.f32.mrb[23].mxu0 }
 0x489   : > { %v2167_v24 = vadd.f32 %v2853_v23, %v1985_v5  ;;  %v1989_v26 = vadd.f32 %v1988_v22, %v4007_v56  ;;  %v2860_v5 = vld [vmem:[%s3272_s23 + $0x180] sm:$0xff] }
 0x48a   : > { %vm2230_vm8 = vcmp.gt.f32.partialorder %v2166_v20, 0.0  ;;  %v2294_v12 = vmul.f32 0.01, %v2166_v20  ;;  %v2170_v28 = vadd.f32 %v2854_v27, %v1987_v17  ;;  %v2861_v17 = vld [vmem:[%s3272_s23 + $0x188] sm:$0xff] }
 0x48b   : > { %vm2231_vm14 = vcmp.gt.f32.partialorder %v2167_v24, 0.0  ;;  %v2295_v13 = vmul.f32 0.01, %v2167_v24  ;;  %v2171_v35 = vadd.f32 %v2855_v31, %v1989_v26  ;;  %v2862_v26 = vld [vmem:[%s3272_s23 + $0x1a0] sm:$0xff] }
 0x48c   : > { %v2358_v38 = vsel %vm2230_vm8, %v2166_v20, %v2294_v12  ;;  %vm2234_vm15 = vcmp.gt.f32.partialorder %v2170_v28, 0.0  ;;  %v2298_v42 = vmul.f32 0.01, %v2170_v28 }
 0x48d   : > { %2422 = vst [vmem:[%s3954_s25 + $0x100] sm:$0xff] %v2358_v38  ;;  %v2359_v50 = vsel %vm2231_vm14, %v2167_v24, %v2295_v13  ;;  %vm2235_vm0 = vcmp.gt.f32.partialorder %v2171_v35, 0.0  ;;  %v2299_v36 = vmul.f32 0.01, %v2171_v35  ;;  %v1992_v45 = vpop.f32.mrb[24].mxu0  ;;  %v4050_v38 = vpop.permute.xlu1 %1836 }
 0x48e   : > { %2423 = vst [vmem:[%s3954_s25 + $0x108] sm:$0xff] %v2359_v50  ;;  %v2362_v52 = vsel %vm2234_vm15, %v2170_v28, %v2298_v42  ;;  %v1993_v57 = vadd.f32 %v1992_v45, %v4018_v44  ;;  %v1994_v54 = vpop.f32.mrb[25].mxu0  ;;  %v2863_v28 = vld [vmem:[%s3272_s23 + $0x1a8] sm:$0xff] }
 0x48f   : > { %2426 = vst [vmem:[%s3954_s25 + $0x120] sm:$0xff] %v2362_v52  ;;  %v2363_v48 = vsel %vm2235_vm0, %v2171_v35, %v2299_v36  ;;  %v1995_v1 = vadd.f32 %v1994_v54, %v4018_v44  ;;  %v1996_v53 = vpop.f32.mrb[26].mxu0  ;;  %v4055_v54 = vpop.permute.xlu0 %1841 }
 0x490   : > { %2427 = vst [vmem:[%s3954_s25 + $0x128] sm:$0xff] %v2363_v48  ;;  %v2174_v11 = vadd.f32 %v2856_v46, %v1993_v57  ;;  %v1997_v30 = vadd.f32 %v1996_v53, %v4023_v60  ;;  %v1998_v33 = vpop.f32.mrb[27].mxu0  ;;  %v2864_v46 = vld [vmem:[%s3272_s23 + $0x1c0] sm:$0xff] }
 0x491   : > { %v2175_v37 = vadd.f32 %v2857_v34, %v1995_v1  ;;  %v1999_v39 = vadd.f32 %v1998_v33, %v4023_v60  ;;  %v2865_v34 = vld [vmem:[%s3272_s23 + $0x1c8] sm:$0xff] }
 0x492   : > { %vm2238_vm1 = vcmp.gt.f32.partialorder %v2174_v11, 0.0  ;;  %v2302_v40 = vmul.f32 0.01, %v2174_v11  ;;  %v2178_v0 = vadd.f32 %v2858_v47, %v1997_v30  ;;  %v2866_v47 = vld [vmem:[%s3272_s23 + $0x1e0] sm:$0xff] }
 0x493   : > { %vm2239_vm2 = vcmp.gt.f32.partialorder %v2175_v37, 0.0  ;;  %v2303_v62 = vmul.f32 0.01, %v2175_v37  ;;  %v2179_v6 = vadd.f32 %v2859_v3, %v1999_v39  ;;  %v2867_v3 = vld [vmem:[%s3272_s23 + $0x1e8] sm:$0xff] }
 0x494   : > { %v2366_v9 = vsel %vm2238_vm1, %v2174_v11, %v2302_v40  ;;  %vm2242_vm3 = vcmp.gt.f32.partialorder %v2178_v0, 0.0  ;;  %v2306_v63 = vmul.f32 0.01, %v2178_v0 }
 0x495   : > { %2430 = vst [vmem:[%s3954_s25 + $0x140] sm:$0xff] %v2366_v9  ;;  %v2367_v7 = vsel %vm2239_vm2, %v2175_v37, %v2303_v62  ;;  %vm2243_vm4 = vcmp.gt.f32.partialorder %v2179_v6, 0.0  ;;  %v2307_v14 = vmul.f32 0.01, %v2179_v6  ;;  %v2002_v16 = vpop.f32.mrb[28].mxu0 }
 0x496   : > { %2431 = vst [vmem:[%s3954_s25 + $0x148] sm:$0xff] %v2367_v7  ;;  %v2370_v21 = vsel %vm2242_vm3, %v2178_v0, %v2306_v63  ;;  %v2003_v25 = vadd.f32 %v2002_v16, %v4034_v2  ;;  %v2004_v49 = vpop.f32.mrb[29].mxu0 }
 0x497   : > { %2434 = vst [vmem:[%s3954_s25 + $0x160] sm:$0xff] %v2370_v21  ;;  %v2371_v55 = vsel %vm2243_vm4, %v2179_v6, %v2307_v14  ;;  %v2005_v43 = vadd.f32 %v2004_v49, %v4034_v2  ;;  %v2006_v4 = vpop.f32.mrb[30].mxu0 }
 0x498   : > { %2435 = vst [vmem:[%s3954_s25 + $0x168] sm:$0xff] %v2371_v55  ;;  %v2182_v8 = vadd.f32 %v2860_v5, %v2003_v25  ;;  %v2007_v15 = vadd.f32 %v2006_v4, %v4039_v51  ;;  %v2008_v20 = vpop.f32.mrb[31].mxu0  ;;  %v2868_v5 = vld [vmem:[%s3272_s23 + $0x10] sm:$0xff] }
 0x499   : > { %v2183_v22 = vadd.f32 %v2861_v17, %v2005_v43  ;;  %v2009_v23 = vadd.f32 %v2008_v20, %v4039_v51  ;;  %v2869_v17 = vld [vmem:[%s3272_s23 + $0x18] sm:$0xff] }
 0x49a   : > { %vm2246_vm5 = vcmp.gt.f32.partialorder %v2182_v8, 0.0  ;;  %v2310_v24 = vmul.f32 0.01, %v2182_v8  ;;  %v2186_v12 = vadd.f32 %v2862_v26, %v2007_v15  ;;  %v2870_v26 = vld [vmem:[%s3272_s23 + $0x30] sm:$0xff] }
 0x49b   : > { %vm2247_vm6 = vcmp.gt.f32.partialorder %v2183_v22, 0.0  ;;  %v2311_v27 = vmul.f32 0.01, %v2183_v22  ;;  %v2187_v13 = vadd.f32 %v2863_v28, %v2009_v23 }
 0x49c   : > { %v2374_v31 = vsel %vm2246_vm5, %v2182_v8, %v2310_v24  ;;  %vm2250_vm10 = vcmp.gt.f32.partialorder %v2186_v12, 0.0  ;;  %v2314_v35 = vmul.f32 0.01, %v2186_v12 }
 0x49d   : > { %2438 = vst [vmem:[%s3954_s25 + $0x180] sm:$0xff] %v2374_v31  ;;  %v2375_v42 = vsel %vm2247_vm6, %v2183_v22, %v2311_v27  ;;  %vm2251_vm11 = vcmp.gt.f32.partialorder %v2187_v13, 0.0  ;;  %v2315_v50 = vmul.f32 0.01, %v2187_v13  ;;  %v2012_v36 = vpop.f32.mrb[32].mxu0  ;;  %v2871_v27 = vld [vmem:[%s3272_s23 + $0x38] sm:$0xff] }
 0x49e   : > { %2439 = vst [vmem:[%s3954_s25 + $0x188] sm:$0xff] %v2375_v42  ;;  %v2378_v45 = vsel %vm2250_vm10, %v2186_v12, %v2314_v35  ;;  %v2013_v52 = vadd.f32 %v2012_v36, %v4050_v38  ;;  %v2014_v57 = vpop.f32.mrb[33].mxu0 }
 0x49f   : > { %2442 = vst [vmem:[%s3954_s25 + $0x1a0] sm:$0xff] %v2378_v45  ;;  %v2379_v48 = vsel %vm2251_vm11, %v2187_v13, %v2315_v50  ;;  %v2015_v1 = vadd.f32 %v2014_v57, %v4050_v38  ;;  %v2016_v53 = vpop.f32.mrb[34].mxu0 }
 0x4a0   : > { %2443 = vst [vmem:[%s3954_s25 + $0x1a8] sm:$0xff] %v2379_v48  ;;  %v2190_v11 = vadd.f32 %v2864_v46, %v2013_v52  ;;  %v2017_v30 = vadd.f32 %v2016_v53, %v4055_v54  ;;  %v2018_v33 = vpop.f32.mrb[35].mxu0 }
 0x4a1   : > { %v2191_v37 = vadd.f32 %v2865_v34, %v2015_v1  ;;  %v2019_v39 = vadd.f32 %v2018_v33, %v4055_v54  ;;  %v2872_v1 = vld [vmem:[%s3272_s23 + $0x50] sm:$0xff] }
 0x4a2   : > { %vm2254_vm9 = vcmp.gt.f32.partialorder %v2190_v11, 0.0  ;;  %v2318_v40 = vmul.f32 0.01, %v2190_v11  ;;  %v2194_v0 = vadd.f32 %v2866_v47, %v2017_v30  ;;  %v2873_v30 = vld [vmem:[%s3272_s23 + $0x58] sm:$0xff] }
 0x4a3   : > { %vm2255_vm7 = vcmp.gt.f32.partialorder %v2191_v37, 0.0  ;;  %v2319_v62 = vmul.f32 0.01, %v2191_v37  ;;  %v2195_v6 = vadd.f32 %v2867_v3, %v2019_v39  ;;  %v2874_v39 = vld [vmem:[%s3272_s23 + $0x70] sm:$0xff]  ;;  %v2875_v47 = vld [vmem:[%s3272_s23 + $0x78] sm:$0xff] }
 0x4a4   : > { %v2382_v9 = vsel %vm2254_vm9, %v2190_v11, %v2318_v40  ;;  %vm2258_vm12 = vcmp.gt.f32.partialorder %v2194_v0, 0.0  ;;  %v2322_v63 = vmul.f32 0.01, %v2194_v0 }
 0x4a5   : > { %2446 = vst [vmem:[%s3954_s25 + $0x1c0] sm:$0xff] %v2382_v9  ;;  %v2383_v7 = vsel %vm2255_vm7, %v2191_v37, %v2319_v62  ;;  %vm2259_vm13 = vcmp.gt.f32.partialorder %v2195_v6, 0.0  ;;  %v2323_v14 = vmul.f32 0.01, %v2195_v6  ;;  %v2055_v16 = vpop.f32.mrb[36].mxu0 }
 0x4a6   : > { %2447 = vst [vmem:[%s3954_s25 + $0x1c8] sm:$0xff] %v2383_v7  ;;  %v2386_v21 = vsel %vm2258_vm12, %v2194_v0, %v2322_v63  ;;  %v2056_v25 = vadd.f32 %v2055_v16, %v3939_v29  ;;  %v2057_v49 = vpop.f32.mrb[37].mxu0 }
 0x4a7   : > { %2450 = vst [vmem:[%s3954_s25 + $0x1e0] sm:$0xff] %v2386_v21  ;;  %v2387_v55 = vsel %vm2259_vm13, %v2195_v6, %v2323_v14  ;;  %v2058_v43 = vadd.f32 %v2057_v49, %v3939_v29  ;;  %v2059_v4 = vpop.f32.mrb[38].mxu0  ;;  %v2876_v49 = vld [vmem:[%s3272_s23 + $0x90] sm:$0xff] }
 0x4a8   : > { %2451 = vst [vmem:[%s3954_s25 + $0x1e8] sm:$0xff] %v2387_v55  ;;  %v2136_v8 = vadd.f32 %v2868_v5, %v2056_v25  ;;  %v2060_v15 = vadd.f32 %v2059_v4, %v3942_v41  ;;  %v2061_v20 = vpop.f32.mrb[39].mxu0  ;;  %v2877_v5 = vld [vmem:[%s3272_s23 + $0x98] sm:$0xff] }
 0x4a9   : > { %v2137_v22 = vadd.f32 %v2869_v17, %v2058_v43  ;;  %v2062_v23 = vadd.f32 %v2061_v20, %v3942_v41  ;;  %v2878_v17 = vld [vmem:[%s3272_s23 + $0xb0] sm:$0xff] }
 0x4aa   : > { %vm2200_vm8 = vcmp.gt.f32.partialorder %v2136_v8, 0.0  ;;  %v2264_v24 = vmul.f32 0.01, %v2136_v8  ;;  %v2140_v12 = vadd.f32 %v2870_v26, %v2060_v15 }
 0x4ab   : > { %vm2201_vm14 = vcmp.gt.f32.partialorder %v2137_v22, 0.0  ;;  %v2265_v29 = vmul.f32 0.01, %v2137_v22  ;;  %v2141_v28 = vadd.f32 %v2871_v27, %v2062_v23  ;;  %v2879_v23 = vld [vmem:[%s3272_s23 + $0xb8] sm:$0xff] }
 0x4ac   : > { %v2328_v13 = vsel %vm2200_vm8, %v2136_v8, %v2264_v24  ;;  %vm2204_vm15 = vcmp.gt.f32.partialorder %v2140_v12, 0.0  ;;  %v2268_v31 = vmul.f32 0.01, %v2140_v12 }
 0x4ad   : > { %2392 = vst [vmem:[%s3954_s25 + $0x10] sm:$0xff] %v2328_v13  ;;  %v2329_v35 = vsel %vm2201_vm14, %v2137_v22, %v2265_v29  ;;  %vm2205_vm0 = vcmp.gt.f32.partialorder %v2141_v28, 0.0  ;;  %v2269_v41 = vmul.f32 0.01, %v2141_v28  ;;  %v2065_v42 = vpop.f32.mrb[40].mxu0 }
 0x4ae   : > { %2393 = vst [vmem:[%s3954_s25 + $0x18] sm:$0xff] %v2329_v35  ;;  %v2332_v50 = vsel %vm2204_vm15, %v2140_v12, %v2268_v31  ;;  %v2066_v36 = vadd.f32 %v2065_v42, %v3951_v32  ;;  %v2067_v45 = vpop.f32.mrb[41].mxu0 }
 0x4af   : > { %2396 = vst [vmem:[%s3954_s25 + $0x30] sm:$0xff] %v2332_v50  ;;  %v2333_v52 = vsel %vm2205_vm0, %v2141_v28, %v2269_v41  ;;  %v2068_v57 = vadd.f32 %v2067_v45, %v3951_v32  ;;  %v2069_v48 = vpop.f32.mrb[42].mxu0  ;;  %v2880_v50 = vld [vmem:[%s3272_s23 + $0xd0] sm:$0xff] }
 0x4b0   : > { %2397 = vst [vmem:[%s3954_s25 + $0x38] sm:$0xff] %v2333_v52  ;;  %v2144_v53 = vadd.f32 %v2872_v1, %v2066_v36  ;;  %v2070_v46 = vadd.f32 %v2069_v48, %v3959_v61  ;;  %v2071_v11 = vpop.f32.mrb[43].mxu0 }
 0x4b1   : > { %v2145_v33 = vadd.f32 %v2873_v30, %v2068_v57  ;;  %v2072_v34 = vadd.f32 %v2071_v11, %v3959_v61  ;;  %v2881_v57 = vld [vmem:[%s3272_s23 + $0xd8] sm:$0xff] }
 0x4b2   : > { %vm2208_vm1 = vcmp.gt.f32.partialorder %v2144_v53, 0.0  ;;  %v2272_v37 = vmul.f32 0.01, %v2144_v53  ;;  %v2148_v40 = vadd.f32 %v2874_v39, %v2070_v46  ;;  %v2882_v46 = vld [vmem:[%s3272_s23 + $0xf0] sm:$0xff]  ;;  %v2883_v30 = vld [vmem:[%s3272_s23 + $0xf8] sm:$0xff] }
 0x4b3   : > { %vm2209_vm2 = vcmp.gt.f32.partialorder %v2145_v33, 0.0  ;;  %v2273_v32 = vmul.f32 0.01, %v2145_v33  ;;  %v2149_v0 = vadd.f32 %v2875_v47, %v2072_v34 }
 0x4b4   : > { %v2336_v62 = vsel %vm2208_vm1, %v2144_v53, %v2272_v37  ;;  %vm2212_vm3 = vcmp.gt.f32.partialorder %v2148_v40, 0.0  ;;  %v2276_v3 = vmul.f32 0.01, %v2148_v40 }
 0x4b5   : > { %2400 = vst [vmem:[%s3954_s25 + $0x50] sm:$0xff] %v2336_v62  ;;  %v2337_v6 = vsel %vm2209_vm2, %v2145_v33, %v2273_v32  ;;  %vm2213_vm4 = vcmp.gt.f32.partialorder %v2149_v0, 0.0  ;;  %v2277_v61 = vmul.f32 0.01, %v2149_v0  ;;  %v2075_v9 = vpop.f32.mrb[44].mxu0 }
 0x4b6   : > { %2401 = vst [vmem:[%s3954_s25 + $0x58] sm:$0xff] %v2337_v6  ;;  %v2340_v63 = vsel %vm2212_vm3, %v2148_v40, %v2276_v3  ;;  %v2076_v7 = vadd.f32 %v2075_v9, %v3970_v58  ;;  %v2077_v14 = vpop.f32.mrb[45].mxu0 }
 0x4b7   : > { %2404 = vst [vmem:[%s3954_s25 + $0x70] sm:$0xff] %v2340_v63  ;;  %v2341_v16 = vsel %vm2213_vm4, %v2149_v0, %v2277_v61  ;;  %v2078_v21 = vadd.f32 %v2077_v14, %v3970_v58  ;;  %v2079_v25 = vpop.f32.mrb[46].mxu0  ;;  %v2884_v61 = vld [vmem:[%s3272_s23 + $0x110] sm:$0xff]  ;;  %v2885_v14 = vld [vmem:[%s3272_s23 + $0x118] sm:$0xff] }
 0x4b8   : > { %2405 = vst [vmem:[%s3954_s25 + $0x78] sm:$0xff] %v2341_v16  ;;  %v2152_v55 = vadd.f32 %v2876_v49, %v2076_v7  ;;  %v2080_v43 = vadd.f32 %v2079_v25, %v3975_v18  ;;  %v2081_v4 = vpop.f32.mrb[47].mxu0  ;;  %v2886_v49 = vld [vmem:[%s3272_s23 + $0x130] sm:$0xff] }
 0x4b9   : > { %v2153_v8 = vadd.f32 %v2877_v5, %v2078_v21  ;;  %v2082_v15 = vadd.f32 %v2081_v4, %v3975_v18 }
 0x4ba   : > { %vm2216_vm5 = vcmp.gt.f32.partialorder %v2152_v55, 0.0  ;;  %v2280_v20 = vmul.f32 0.01, %v2152_v55  ;;  %v2156_v22 = vadd.f32 %v2878_v17, %v2080_v43  ;;  %v2887_v43 = vld [vmem:[%s3272_s23 + $0x138] sm:$0xff] }
 0x4bb   : > { %vm2217_vm6 = vcmp.gt.f32.partialorder %v2153_v8, 0.0  ;;  %v2281_v58 = vmul.f32 0.01, %v2153_v8  ;;  %v2157_v24 = vadd.f32 %v2879_v23, %v2082_v15 }
 0x4bc   : > { %v2344_v26 = vsel %vm2216_vm5, %v2152_v55, %v2280_v20  ;;  %vm2220_vm10 = vcmp.gt.f32.partialorder %v2156_v22, 0.0  ;;  %v2284_v12 = vmul.f32 0.01, %v2156_v22 }
 0x4bd   : > { %2408 = vst [vmem:[%s3954_s25 + $0x90] sm:$0xff] %v2344_v26  ;;  %v2345_v29 = vsel %vm2217_vm6, %v2153_v8, %v2281_v58  ;;  %vm2221_vm11 = vcmp.gt.f32.partialorder %v2157_v24, 0.0  ;;  %v2285_v18 = vmul.f32 0.01, %v2157_v24  ;;  %v2085_v27 = vpop.f32.mrb[48].mxu0 }
 0x4be   : > { %2409 = vst [vmem:[%s3954_s25 + $0x98] sm:$0xff] %v2345_v29  ;;  %v2348_v28 = vsel %vm2220_vm10, %v2156_v22, %v2284_v12  ;;  %v2086_v13 = vadd.f32 %v2085_v27, %v3986_v59  ;;  %v2087_v31 = vpop.f32.mrb[49].mxu0  ;;  %v2888_v12 = vld [vmem:[%s3272_s23 + $0x150] sm:$0xff] }
 0x4bf   : > { %2412 = vst [vmem:[%s3954_s25 + $0xb0] sm:$0xff] %v2348_v28  ;;  %v2349_v35 = vsel %vm2221_vm11, %v2157_v24, %v2285_v18  ;;  %v2088_v41 = vadd.f32 %v2087_v31, %v3986_v59  ;;  %v2089_v42 = vpop.f32.mrb[50].mxu0  ;;  %v2889_v28 = vld [vmem:[%s3272_s23 + $0x158] sm:$0xff] }
 0x4c0   : > { %2413 = vst [vmem:[%s3954_s25 + $0xb8] sm:$0xff] %v2349_v35  ;;  %v2160_v36 = vadd.f32 %v2880_v50, %v2086_v13  ;;  %v2090_v45 = vadd.f32 %v2089_v42, %v3991_v10  ;;  %v2091_v52 = vpop.f32.mrb[51].mxu0  ;;  %v2891_v50 = vld [vmem:[%s3272_s23 + $0x178] sm:$0xff] }
 0x4c1   : > { %v2161_v48 = vadd.f32 %v2881_v57, %v2088_v41  ;;  %v2092_v1 = vadd.f32 %v2091_v52, %v3991_v10  ;;  %v2890_v41 = vld [vmem:[%s3272_s23 + $0x170] sm:$0xff] }
 0x4c2   : > { %vm2224_vm9 = vcmp.gt.f32.partialorder %v2160_v36, 0.0  ;;  %v2288_v53 = vmul.f32 0.01, %v2160_v36  ;;  %v2164_v11 = vadd.f32 %v2882_v46, %v2090_v45 }
 0x4c3   : > { %vm2225_vm7 = vcmp.gt.f32.partialorder %v2161_v48, 0.0  ;;  %v2289_v59 = vmul.f32 0.01, %v2161_v48  ;;  %v2165_v33 = vadd.f32 %v2883_v30, %v2092_v1 }
 0x4c4   : > { %v2352_v34 = vsel %vm2224_vm9, %v2160_v36, %v2288_v53  ;;  %vm2228_vm12 = vcmp.gt.f32.partialorder %v2164_v11, 0.0  ;;  %v2292_v37 = vmul.f32 0.01, %v2164_v11 }
 0x4c5   : > { %2416 = vst [vmem:[%s3954_s25 + $0xd0] sm:$0xff] %v2352_v34  ;;  %v2353_v39 = vsel %vm2225_vm7, %v2161_v48, %v2289_v59  ;;  %vm2229_vm13 = vcmp.gt.f32.partialorder %v2165_v33, 0.0  ;;  %v2293_v10 = vmul.f32 0.01, %v2165_v33  ;;  %v2095_v40 = vpop.f32.mrb[52].mxu0 }
 0x4c6   : > { %2417 = vst [vmem:[%s3954_s25 + $0xd8] sm:$0xff] %v2353_v39  ;;  %v2356_v32 = vsel %vm2228_vm12, %v2164_v11, %v2292_v37  ;;  %v2096_v47 = vadd.f32 %v2095_v40, %v4002_v19  ;;  %v2097_v0 = vpop.f32.mrb[53].mxu0 }
 0x4c7   : > { %2420 = vst [vmem:[%s3954_s25 + $0xf0] sm:$0xff] %v2356_v32  ;;  %v2357_v62 = vsel %vm2229_vm13, %v2165_v33, %v2293_v10  ;;  %v2098_v3 = vadd.f32 %v2097_v0, %v4002_v19  ;;  %v2099_v6 = vpop.f32.mrb[54].mxu0  ;;  %v2892_v33 = vld [vmem:[%s3272_s23 + $0x190] sm:$0xff]  ;;  %v2893_v10 = vld [vmem:[%s3272_s23 + $0x198] sm:$0xff] }
 0x4c8   : > { %2421 = vst [vmem:[%s3954_s25 + $0xf8] sm:$0xff] %v2357_v62  ;;  %v2168_v9 = vadd.f32 %v2884_v61, %v2096_v47  ;;  %v2100_v63 = vadd.f32 %v2099_v6, %v4007_v56  ;;  %v2101_v7 = vpop.f32.mrb[55].mxu0  ;;  %v2894_v0 = vld [vmem:[%s3272_s23 + $0x1b0] sm:$0xff] }
 0x4c9   : > { %v2169_v16 = vadd.f32 %v2885_v14, %v2098_v3  ;;  %v2102_v21 = vadd.f32 %v2101_v7, %v4007_v56  ;;  %v2895_v3 = vld [vmem:[%s3272_s23 + $0x1b8] sm:$0xff] }
 0x4ca   : > { %vm2232_vm8 = vcmp.gt.f32.partialorder %v2168_v9, 0.0  ;;  %v2296_v25 = vmul.f32 0.01, %v2168_v9  ;;  %v2172_v55 = vadd.f32 %v2886_v49, %v2100_v63 }
 0x4cb   : > { %vm2233_vm14 = vcmp.gt.f32.partialorder %v2169_v16, 0.0  ;;  %v2297_v19 = vmul.f32 0.01, %v2169_v16  ;;  %v2173_v4 = vadd.f32 %v2887_v43, %v2102_v21 }
 0x4cc   : > { %v2360_v5 = vsel %vm2232_vm8, %v2168_v9, %v2296_v25  ;;  %vm2236_vm15 = vcmp.gt.f32.partialorder %v2172_v55, 0.0  ;;  %v2300_v8 = vmul.f32 0.01, %v2172_v55 }
 0x4cd   : > { %2424 = vst [vmem:[%s3954_s25 + $0x110] sm:$0xff] %v2360_v5  ;;  %v2361_v15 = vsel %vm2233_vm14, %v2169_v16, %v2297_v19  ;;  %vm2237_vm0 = vcmp.gt.f32.partialorder %v2173_v4, 0.0  ;;  %v2301_v56 = vmul.f32 0.01, %v2173_v4  ;;  %v2105_v20 = vpop.f32.mrb[56].mxu0  ;;  %v2896_v19 = vld [vmem:[%s3272_s23 + $0x1d0] sm:$0xff] }
 0x4ce   : > { %2425 = vst [vmem:[%s3954_s25 + $0x118] sm:$0xff] %v2361_v15  ;;  %v2364_v17 = vsel %vm2236_vm15, %v2172_v55, %v2300_v8  ;;  %v2106_v22 = vadd.f32 %v2105_v20, %v4018_v44  ;;  %v2107_v58 = vpop.f32.mrb[57].mxu0  ;;  %v2897_v8 = vld [vmem:[%s3272_s23 + $0x1d8] sm:$0xff] }
 0x4cf   : > { %2428 = vst [vmem:[%s3954_s25 + $0x130] sm:$0xff] %v2364_v17  ;;  %v2365_v23 = vsel %vm2237_vm0, %v2173_v4, %v2301_v56  ;;  %v2108_v24 = vadd.f32 %v2107_v58, %v4018_v44  ;;  %v2109_v26 = vpop.f32.mrb[58].mxu0  ;;  %v2898_v17 = vld [vmem:[%s3272_s23 + $0x1f0] sm:$0xff]  ;;  %v2899_v58 = vld [vmem:[%s3272_s23 + $0x1f8] sm:$0xff]  ;;  %s4264_s23 = sand.u32 1, %s2970_s28  }
 0x4d0   : > { %2429 = vst [vmem:[%s3954_s25 + $0x138] sm:$0xff] %v2365_v23  ;;  %v2176_v29 = vadd.f32 %v2888_v12, %v2106_v22  ;;  %v2110_v18 = vadd.f32 %v2109_v26, %v4023_v60  ;;  %v2111_v27 = vpop.f32.mrb[59].mxu0  ;;  %s4178_s10 = scalar_lea.sflag [#allocation4], %s4264_s23 }
 0x4d1   : > { %v2177_v13 = vadd.f32 %v2889_v28, %v2108_v24  ;;  %v2112_v31 = vadd.f32 %v2111_v27, %v4023_v60 }
 0x4d2   : > { %vm2240_vm1 = vcmp.gt.f32.partialorder %v2176_v29, 0.0  ;;  %v2304_v35 = vmul.f32 0.01, %v2176_v29  ;;  %v2180_v42 = vadd.f32 %v2890_v41, %v2110_v18 }
 0x4d3   : > { %vm2241_vm2 = vcmp.gt.f32.partialorder %v2177_v13, 0.0  ;;  %v2305_v44 = vmul.f32 0.01, %v2177_v13  ;;  %v2181_v36 = vadd.f32 %v2891_v50, %v2112_v31 }
 0x4d4   : > { %v2368_v45 = vsel %vm2240_vm1, %v2176_v29, %v2304_v35  ;;  %vm2244_vm3 = vcmp.gt.f32.partialorder %v2180_v42, 0.0  ;;  %v2308_v52 = vmul.f32 0.01, %v2180_v42 }
 0x4d5   : > { %2432 = vst [vmem:[%s3954_s25 + $0x150] sm:$0xff] %v2368_v45  ;;  %v2369_v57 = vsel %vm2241_vm2, %v2177_v13, %v2305_v44  ;;  %vm2245_vm4 = vcmp.gt.f32.partialorder %v2181_v36, 0.0  ;;  %v2309_v60 = vmul.f32 0.01, %v2181_v36  ;;  %v2115_v48 = vpop.f32.mrb[60].mxu0 }
 0x4d6   : > { %2433 = vst [vmem:[%s3954_s25 + $0x158] sm:$0xff] %v2369_v57  ;;  %v2372_v1 = vsel %vm2244_vm3, %v2180_v42, %v2308_v52  ;;  %v2116_v53 = vadd.f32 %v2115_v48, %v4034_v2  ;;  %v2117_v46 = vpop.f32.mrb[61].mxu0 }
 0x4d7   : > { %2436 = vst [vmem:[%s3954_s25 + $0x170] sm:$0xff] %v2372_v1  ;;  %v2373_v11 = vsel %vm2245_vm4, %v2181_v36, %v2309_v60  ;;  %v2118_v59 = vadd.f32 %v2117_v46, %v4034_v2  ;;  %v2119_v30 = vpop.f32.mrb[62].mxu0 }
 0x4d8   : > { %2437 = vst [vmem:[%s3954_s25 + $0x178] sm:$0xff] %v2373_v11  ;;  %v2184_v34 = vadd.f32 %v2892_v33, %v2116_v53  ;;  %v2120_v37 = vadd.f32 %v2119_v30, %v4039_v51  ;;  %v2121_v39 = vpop.f32.mrb[63].mxu0 }
 0x4d9   : > { %v2185_v40 = vadd.f32 %v2893_v10, %v2118_v59  ;;  %v2122_v32 = vadd.f32 %v2121_v39, %v4039_v51 }
 0x4da   : > { %vm2248_vm5 = vcmp.gt.f32.partialorder %v2184_v34, 0.0  ;;  %v2312_v47 = vmul.f32 0.01, %v2184_v34  ;;  %v2188_v2 = vadd.f32 %v2894_v0, %v2120_v37 }
 0x4db   : > { %vm2249_vm6 = vcmp.gt.f32.partialorder %v2185_v40, 0.0  ;;  %v2313_v62 = vmul.f32 0.01, %v2185_v40  ;;  %v2189_v6 = vadd.f32 %v2895_v3, %v2122_v32 }
 0x4dc   : > { %v2376_v61 = vsel %vm2248_vm5, %v2184_v34, %v2312_v47  ;;  %vm2252_vm10 = vcmp.gt.f32.partialorder %v2188_v2, 0.0  ;;  %v2316_v9 = vmul.f32 0.01, %v2188_v2 }
 0x4dd   : > { %2440 = vst [vmem:[%s3954_s25 + $0x190] sm:$0xff] %v2376_v61  ;;  %v2377_v63 = vsel %vm2249_vm6, %v2185_v40, %v2313_v62  ;;  %vm2253_vm11 = vcmp.gt.f32.partialorder %v2189_v6, 0.0  ;;  %v2317_v51 = vmul.f32 0.01, %v2189_v6  ;;  %v2125_v7 = vpop.f32.mrb[64].mxu0 }
 0x4de   : > { %2441 = vst [vmem:[%s3954_s25 + $0x198] sm:$0xff] %v2377_v63  ;;  %v2380_v14 = vsel %vm2252_vm10, %v2188_v2, %v2316_v9  ;;  %v2126_v16 = vadd.f32 %v2125_v7, %v4050_v38  ;;  %v2127_v21 = vpop.f32.mrb[65].mxu0 }
 0x4df   : > { %2444 = vst [vmem:[%s3954_s25 + $0x1b0] sm:$0xff] %v2380_v14  ;;  %v2381_v25 = vsel %vm2253_vm11, %v2189_v6, %v2317_v51  ;;  %v2128_v49 = vadd.f32 %v2127_v21, %v4050_v38  ;;  %v2129_v55 = vpop.f32.mrb[66].mxu0 }
 0x4e0   : > { %2445 = vst [vmem:[%s3954_s25 + $0x1b8] sm:$0xff] %v2381_v25  ;;  %v2192_v43 = vadd.f32 %v2896_v19, %v2126_v16  ;;  %v2130_v4 = vadd.f32 %v2129_v55, %v4055_v54  ;;  %v2131_v5 = vpop.f32.mrb[67].mxu0 }
 0x4e1   : > { %v2193_v15 = vadd.f32 %v2897_v8, %v2128_v49  ;;  %v2132_v56 = vadd.f32 %v2131_v5, %v4055_v54 }
 0x4e2   : > { %vm2256_vm9 = vcmp.gt.f32.partialorder %v2192_v43, 0.0  ;;  %v2320_v20 = vmul.f32 0.01, %v2192_v43  ;;  %v2196_v22 = vadd.f32 %v2898_v17, %v2130_v4 }
 0x4e3   : > { %vm2257_vm7 = vcmp.gt.f32.partialorder %v2193_v15, 0.0  ;;  %v2321_v38 = vmul.f32 0.01, %v2193_v15  ;;  %v2197_v23 = vadd.f32 %v2899_v58, %v2132_v56 }
 0x4e4   : > { %v2384_v24 = vsel %vm2256_vm9, %v2192_v43, %v2320_v20  ;;  %vm2260_vm12 = vcmp.gt.f32.partialorder %v2196_v22, 0.0  ;;  %v2324_v26 = vmul.f32 0.01, %v2196_v22 }
 0x4e5   : > { %2448 = vst [vmem:[%s3954_s25 + $0x1d0] sm:$0xff] %v2384_v24  ;;  %v2385_v54 = vsel %vm2257_vm7, %v2193_v15, %v2321_v38  ;;  %vm2261_vm13 = vcmp.gt.f32.partialorder %v2197_v23, 0.0  ;;  %v2325_v12 = vmul.f32 0.01, %v2197_v23 }
 0x4e6   : > { %2449 = vst [vmem:[%s3954_s25 + $0x1d8] sm:$0xff] %v2385_v54  ;;  %v2388_v29 = vsel %vm2260_vm12, %v2196_v22, %v2324_v26 }
 0x4e7   : > { %2452 = vst [vmem:[%s3954_s25 + $0x1f0] sm:$0xff] %v2388_v29  ;;  %v2389_v18 = vsel %vm2261_vm13, %v2197_v23, %v2325_v12 }
 0x4e8   : > { %2453 = vst [vmem:[%s3954_s25 + $0x1f8] sm:$0xff] %v2389_v18 }
 0x4e9   : > { %2913 = shalt.err (!%p2910_p11)
}
 0x4ea   : > { %s2914_s26 = scalar_lea.hbm %s4168_s0, 8192  ;;  %s2918_s16 = scalar_lea.hbm %s4238_s8, 32768 }
 0x4eb   : > { %p2915_p12 = scmp.ne.s32.totalorder %s4168_s0, %s2914_s26  ;;  %p2919_p1 = scmp.lt.u32.totalorder %s4168_s0, %s4238_s8 }
 0x4ec   : > { %p2920_p2 = scmp.lt.u32.totalorder %s2918_s16, %s2914_s26  ;;  %p2922_p4 = scmp.lt.u32.totalorder %s2914_s26, %s4168_s0 }
 0x4ed   : > { %p2916_p13 = pnand %p2915_p12, %p3109_p8 }
 0x4ee   : > { %p2921_p3 = por %p2920_p2, %p2919_p1 }
 0x4ef   : > { %p2917_p0 = pneg %p2916_p13 }
 0x4f0   : > { %p2923_p5 = por %p2922_p4, %p2921_p3 }
 0x4f2   : > { %p2924_p6 = pnand %p2923_p5, %p2917_p0 }
 0x4f4   : > { %2927 = shalt.err (!%p2924_p6)
}
 0x4f5   : > { %s3001_s30 = smov 512   ;;  %s3002_s21 = smov 1024  }
 0x4f6   : > { %s3003_s22 = smov 32  }
 0x4f7   : > { %2740 = dma.vmem_to_hbm [thread:$0]  (%p3109_p8), %s4171_s9, 8192, %s4168_s0, %s4178_s10, %s3001_s30, %s3002_s21, %s3003_s22  }
 0x4f8 PF: > { %p2746_p7 = scmp.ge.s32.totalorder %s2994_s12, 2  ;;  %s2485_s23 = sand.u32 1, %s2966_s27  }
 0x4f9   : > { %s2486_s11 = scalar_lea.sflag [#allocation4], %s2485_s23 }
 0x4fa   : > { %p2743_p10 = pnand %p2746_p7, %p3113_p9 }
 0x4fc   : > { %2961 = dma.done.wait (!%p2743_p10), %s2486_s11, 8192  }
 0x4fd   : > { %2963 = vsyncadd (!%p2743_p10), %s2486_s11, 4294959104  ;;  %s21_s12 = sadd.s32 1, %s2994_s12   ;;  %s4265_s24 = sld [smem:[#allocation10_spill]] }
 0x4fe   : > { %p18_p11 = scmp.ge.s32.totalorder %s21_s12, 6   ;;  %s4266_s30 = sld [smem:[#allocation6_spill]] }
 0x4ff   : > { %s4267_s9 = sld [smem:[#allocation7_spill]]  ;;  %s4268_s10 = sld [smem:[#allocation8_spill]] }
 0x500   : > { %s4269_s11 = sld [smem:[#allocation9_spill]]  ;;  %s4270_s27 = smov %s2970_s28 }
 0x501   : > { %s4271_s28 = smov %s2974_s29  ;;  %20 = sbr.rel (!%p18_p11) target bundleno = 7 (0x7), region = 120 }
 0x503   : > { %s4272_s29 = smov %s4265_s24 }
 0x508   :  { %2491 = vsyncpa [#allocation4], 1 }
 0x509   :  { %2493 = vsyncpa [#allocation4 + $0x1], 1 }

</bundles_post_ra>
